<compile_context>
chip_gen: v7x
topology: tpu7x:2x2x1
jax: 0.10.0
libtpu: 0.0.40
codegen_flags: <defaults>
</compile_context>

<pallas_src>
import functools
import math

import jax
import jax.numpy as jnp
from jax import lax
from jax.experimental import pallas as pl
from jax.experimental.pallas import tpu as pltpu


# ----------------------------------------------------------------------------
# tiling helpers
# ----------------------------------------------------------------------------
def _pick_tile(dim, target, align):
    """Largest tile <= target that is align-multiple and divides dim, else full dim."""
    if dim <= target:
        return dim
    t = (target // align) * align
    while t >= align:
        if dim % t == 0:
            return t
        t -= align
    return dim


def _pick_divisor(dim, target):
    """Largest divisor of dim that is <= target (>=1)."""
    t = max(1, min(dim, target))
    while dim % t != 0:
        t -= 1
    return t


# ----------------------------------------------------------------------------
# Tiled linear: y = x @ w_t + b, f32 VMEM accumulator over the K grid axis.
# x / w_t are bf16 at the call boundary; bias add + output cast at finalize.
# ----------------------------------------------------------------------------
def _linear_kernel(x_ref, w_ref, b_ref, o_ref, acc_ref):
    k = pl.program_id(2)

    @pl.when(k == 0)
    def _():
        acc_ref[...] = jnp.zeros_like(acc_ref)

    acc_ref[...] += jnp.dot(x_ref[...], w_ref[...],
                            preferred_element_type=jnp.float32)

    @pl.when(k == pl.num_programs(2) - 1)
    def _():
        o_ref[...] = (acc_ref[...] + b_ref[...]).astype(o_ref.dtype)


def pallas_linear(x2d, w_t, b, *, out_dtype=jnp.float32, tm=512, tn=512, tk=512):
    """y = x2d @ w_t + b.  x2d: (M, Din) bf16, w_t: (Din, Dout) bf16 (pre-transposed),
    b: (1, Dout) f32."""
    M, Din = x2d.shape
    Dout = w_t.shape[1]

    tm = _pick_tile(M, tm, 8)
    tn = _pick_tile(Dout, tn, 128)
    tk = _pick_tile(Din, tk, 128)
    grid = (M // tm, Dout // tn, Din // tk)

    cost = pl.CostEstimate(
        flops=2 * M * Din * Dout,
        transcendentals=0,
        bytes_accessed=2 * (M * Din + Din * Dout) + 4 * Dout + M * Dout * jnp.dtype(out_dtype).itemsize,
    )
    return pl.pallas_call(
        _linear_kernel,
        out_shape=jax.ShapeDtypeStruct((M, Dout), out_dtype),
        grid=grid,
        in_specs=[
            pl.BlockSpec((tm, tk), lambda i, j, k: (i, k)),
            pl.BlockSpec((tk, tn), lambda i, j, k: (k, j)),
            pl.BlockSpec((1, tn), lambda i, j, k: (0, j)),
        ],
        out_specs=pl.BlockSpec((tm, tn), lambda i, j, k: (i, j)),
        scratch_shapes=[pltpu.VMEM((tm, tn), jnp.float32)],
        compiler_params=pltpu.CompilerParams(
            dimension_semantics=("parallel", "parallel", "arbitrary")
        ),
        cost_estimate=cost,
    )(x2d, w_t, b)


# ----------------------------------------------------------------------------
# Attention + fused output projection.
# Grid: (batch_group, query_tile).  qkv is passed twice: a (Bt, tq, 3D) query tile
# and a (Bt, S, 3D) KV-resident block (same block index across the query axis, so
# it is DMA'd once per batch group).  Importance is accumulated across query tiles
# into the resident (Bt, H, S) output block.
# ----------------------------------------------------------------------------
def _attn_kernel(q_ref, kv_ref, wc_ref, bc_ref, o_ref, imp_ref,
                 *, n_head, head_dim, seq_total):
    qi = pl.program_id(1)

    @pl.when(qi == 0)
    def _():
        imp_ref[...] = jnp.zeros_like(imp_ref)

    d = n_head * head_dim
    bt = q_ref.shape[0]
    tq = q_ref.shape[1]
    inv_nq = 1.0 / float(seq_total)       # mean over the (full) query axis

    acc = jnp.zeros((bt, tq, d), jnp.float32)
    for h in range(n_head):
        base = h * head_dim
        q = q_ref[:, :, base:base + head_dim]                    # (Bt, tq, hd) bf16, 1/scale pre-folded
        k = kv_ref[:, :, d + base:d + base + head_dim]           # (Bt, S, hd)  bf16
        v = kv_ref[:, :, 2 * d + base:2 * d + base + head_dim]   # (Bt, S, hd)  bf16

        s = jnp.einsum('bqd,bkd->bqk', q, k,
                       preferred_element_type=jnp.float32)       # (Bt, tq, S) f32
        m = jnp.max(s, axis=-1, keepdims=True)
        e = jnp.exp(s - m)
        denom = jnp.sum(e, axis=-1, keepdims=True)
        p = e * pl.reciprocal(denom, approx=True)                # softmax (f32)

        # per-key importance: XLU column reduction, accumulated across query tiles
        imp_ref[:, h:h + 1, :] += jnp.sum(p, axis=1, keepdims=True) * inv_nq

        # dropout is identity in eval mode
        out_h = jnp.einsum('bqk,bkd->bqd', p.astype(jnp.bfloat16), v,
                           preferred_element_type=jnp.float32)   # (Bt, tq, hd)
        # fused fc_concat: out @ Wc.T == sum_h out_h @ Wc.T[h*hd:(h+1)*hd, :]
        acc = acc + jnp.einsum('bqh,hd->bqd',
                               out_h.astype(jnp.bfloat16),
                               wc_ref[base:base + head_dim, :],
                               preferred_element_type=jnp.float32)

    o_ref[...] = (acc + bc_ref[...]).astype(o_ref.dtype)


def pallas_attention(qkv, wc_t, bc, batch, seq, n_head, head_dim):
    """qkv: (B, S, 3D) bf16.  wc_t: (D, D) bf16 (pre-transposed fc_concat weight),
    bc: (1, D) f32.  Returns out (B, S, D) f32 (already projected), imp (B, H, S) f32."""
    d_model = n_head * head_dim

    # batch-group sized so the resident KV block stays small; query tile caps S usage.
    kv_bytes_per_batch = seq * 3 * d_model * 2            # bf16
    bt = _pick_divisor(batch, max(1, (4 << 20) // max(kv_bytes_per_batch, 1)))
    tq = _pick_tile(seq, 256, 8)
    grid = (batch // bt, seq // tq)

    kernel = functools.partial(
        _attn_kernel, n_head=n_head, head_dim=head_dim, seq_total=seq)

    cost = pl.CostEstimate(
        flops=4 * batch * n_head * seq * seq * head_dim + 2 * batch * seq * d_model * d_model,
        transcendentals=batch * n_head * seq * seq,
        bytes_accessed=(2 * batch * seq * 3 * d_model * 2       # qkv read twice (bf16)
                        + d_model * d_model * 2 + 4 * d_model    # wc_t + bc
                        + 4 * batch * seq * d_model              # out (f32)
                        + 4 * batch * n_head * seq),             # importance
    )

    # rough per-step VMEM estimate; raise the scoped limit (with headroom) if needed
    est = 2 * (bt * seq * 3 * d_model * 2
               + bt * tq * 3 * d_model * 2
               + bt * tq * d_model * 4
               + bt * n_head * seq * 4)
    est += d_model * d_model * 2 + 4 * d_model
    est += 6 * bt * tq * seq * 4                               # score/exp/softmax temps
    vmem_limit = None
    if est > 30 * (1 << 20):
        vmem_limit = min(int(est * 1.25), 48 * (1 << 20))

    out, imp = pl.pallas_call(
        kernel,
        out_shape=(jax.ShapeDtypeStruct((batch, seq, d_model), jnp.float32),
                   jax.ShapeDtypeStruct((batch, n_head, seq), jnp.float32)),
        grid=grid,
        in_specs=[
            pl.BlockSpec((bt, tq, 3 * d_model), lambda b, q: (b, q, 0)),   # query tile
            pl.BlockSpec((bt, seq, 3 * d_model), lambda b, q: (b, 0, 0)),  # resident K/V
            pl.BlockSpec((d_model, d_model), lambda b, q: (0, 0)),         # fc_concat W.T
            pl.BlockSpec((1, d_model), lambda b, q: (0, 0)),               # fc_concat bias
        ],
        out_specs=(
            pl.BlockSpec((bt, tq, d_model), lambda b, q: (b, q, 0)),
            pl.BlockSpec((bt, n_head, seq), lambda b, q: (b, 0, 0)),       # accumulated over q
        ),
        compiler_params=pltpu.CompilerParams(
            dimension_semantics=("parallel", "arbitrary"),
            vmem_limit_bytes=vmem_limit,
        ),
        cost_estimate=cost,
    )(qkv, qkv, wc_t, bc)
    return out, imp


# ----------------------------------------------------------------------------
# Parameters & wrappers
# ----------------------------------------------------------------------------
def init_params(key, d_model):
    """Deterministic PyTorch-Linear-like init (uniform(-1/sqrt(fan_in), ...))."""
    bound = 1.0 / math.sqrt(d_model)
    names = ["weight_q", "weight_k", "weight_v", "fc_concat"]
    params = {}
    for name in names:
        key, kw, kb = jax.random.split(key, 3)
        params[name] = {
            "w": jax.random.uniform(kw, (d_model, d_model), jnp.float32, -bound, bound),
            "b": jax.random.uniform(kb, (d_model,), jnp.float32, -bound, bound),
        }
    return params


def prepare_params(params, d_model, n_head):
    """One-time weight prep (hoisted out of the forward): transpose, fuse QKV,
    fold 1/sqrt(head_dim) into Wq/bq, cast matmul operands to bf16."""
    head_dim = d_model // n_head
    inv_scale = 1.0 / math.sqrt(float(head_dim))
    wq_t = params["weight_q"]["w"].T * inv_scale
    wk_t = params["weight_k"]["w"].T
    wv_t = params["weight_v"]["w"].T
    w_qkv_t = jnp.concatenate([wq_t, wk_t, wv_t], axis=1).astype(jnp.bfloat16)  # (D, 3D)
    b_qkv = jnp.concatenate([params["weight_q"]["b"] * inv_scale,
                             params["weight_k"]["b"],
                             params["weight_v"]["b"]]).reshape(1, -1).astype(jnp.float32)
    wc_t = params["fc_concat"]["w"].T.astype(jnp.bfloat16)                       # (D, D)
    bc = params["fc_concat"]["b"].reshape(1, -1).astype(jnp.float32)
    return {"w_qkv_t": w_qkv_t, "b_qkv": b_qkv, "wc_t": wc_t, "bc": bc}


def core_token_attention_forward(prep, x, d_model, n_head):
    """Forward of CoreTokenAttention_test (pruning=True, mask=None, topk_indices=None).
    Returns (out_p, topk_indices)."""
    B, S, D = x.shape
    assert D == d_model
    head_dim = d_model // n_head

    # Fused QKV projection: x read once (bf16), lane-dense (M, 3D) bf16 output.
    x2d = x.reshape(B * S, D).astype(jnp.bfloat16)
    qkv = pallas_linear(x2d, prep["w_qkv_t"], prep["b_qkv"],
                        out_dtype=jnp.bfloat16)                 # (B*S, 3D) bf16
    qkv = qkv.reshape(B, S, 3 * D)                              # free reshape

    # Attention with the fc_concat projection fused into the epilogue.
    out_p, importance = pallas_attention(qkv, prep["wc_t"], prep["bc"],
                                         B, S, n_head, head_dim)

    # top-k over per-key importance (matches torch.topk: largest, sorted) — XLA glue
    r = round(0.5 ** (1 / 6), 1)          # = 0.9
    r = int(S * r)
    topk_indices = lax.top_k(importance, r)[1]                  # (B, H, r)

    return out_p, topk_indices


# ----------------------------------------------------------------------------
# Pure-JAX f32 reference (for a loose-tolerance sanity check)
# ----------------------------------------------------------------------------
def _reference_forward(params, x, d_model, n_head):
    B, S, D = x.shape
    hd = d_model // n_head

    def lin(p, v):
        return v @ p["w"].T + p["b"]

    Q = lin(params["weight_q"], x)
    K = lin(params["weight_k"], x)
    V = lin(params["weight_v"], x)
    Qp = Q.reshape(B, S, n_head, hd).transpose(0, 2, 1, 3)
    Kp = K.reshape(B, S, n_head, hd).transpose(0, 2, 1, 3)
    Vp = V.reshape(B, S, n_head, hd).transpose(0, 2, 1, 3)
    scores = jnp.einsum('bhqd,bhkd->bhqk', Qp, Kp) / math.sqrt(hd)
    attn = jax.nn.softmax(scores, axis=-1)
    imp = attn.mean(axis=2)
    out = jnp.einsum('bhqk,bhkd->bhqd', attn, Vp)
    out = out.transpose(0, 2, 1, 3).reshape(B, S, d_model)
    out = out @ params["fc_concat"]["w"].T + params["fc_concat"]["b"]
    return out, imp


# ----------------------------------------------------------------------------
if __name__ == "__main__":
    d_model = 32
    n_head = 4
    batch = 2
    seq = 8

    key = jax.random.PRNGKey(0)
    key, kp, kx = jax.random.split(key, 3)
    params = init_params(kp, d_model)
    x = jax.random.normal(kx, (batch, seq, d_model), jnp.float32)

    prep = prepare_params(params, d_model, n_head)   # hoisted, one-time weight prep

    fwd = jax.jit(functools.partial(core_token_attention_forward,
                                    d_model=d_model, n_head=n_head))
    out_p, topk_indices = fwd(prep, x)
    jax.block_until_ready((out_p, topk_indices))

    assert out_p.shape == (batch, seq, d_model)
    assert topk_indices.shape == (batch, n_head, int(seq * 0.9))

    # Loose tolerance: bf16 MXU operands + approx reciprocal vs. f32 reference.
    ref_out, _ = _reference_forward(params, x, d_model, n_head)
    assert jnp.allclose(out_p, ref_out, atol=7e-2, rtol=7e-2), float(
        jnp.max(jnp.abs(out_p - ref_out)))

    print("KERNEL_OK")
</pallas_src>

<mosaic_0001>
module attributes {stable_mosaic.version = 11 : i64} {
  func.func @_linear_kernel(%arg0: i32, %arg1: i32, %arg2: i32, %arg3: memref<16x32xbf16, #tpu.memory_space<vmem>>, %arg4: memref<32x96xbf16, #tpu.memory_space<vmem>>, %arg5: memref<1x96xf32, #tpu.memory_space<vmem>>, %arg6: memref<16x96xbf16, #tpu.memory_space<vmem>>, %arg7: memref<16x96xf32, #tpu.memory_space<vmem>>) attributes {dimension_semantics = [#tpu.dimension_semantics<parallel>, #tpu.dimension_semantics<parallel>, #tpu.dimension_semantics<arbitrary>], iteration_bounds = array<i64: 1, 1, 1>, scalar_prefetch = 0 : i64, scratch_operands = 1 : i64, tpu.core_type = #tpu.core_type<tc>, window_params = [{transform_indices = @transform_0, window_bounds = array<i64: 16, 32>}, {transform_indices = @transform_1, window_bounds = array<i64: 32, 96>}, {transform_indices = @transform_2, window_bounds = array<i64: 1, 96>}, {transform_indices = @transform_3, window_bounds = array<i64: 16, 96>}]} {
    %c0_i32 = arith.constant 0 : i32
    %0 = arith.cmpi eq, %arg2, %c0_i32 : i32
    %1 = arith.extui %0 : i1 to i32
    %c0_i32_0 = arith.constant 0 : i32
    %2 = arith.cmpi ne, %1, %c0_i32_0 : i32
    scf.if %2 {
      %cst_10 = arith.constant 0.000000e+00 : f32
      %12 = vector.broadcast %cst_10 : f32 to vector<16x96xf32>
      %c0_11 = arith.constant 0 : index
      %c0_12 = arith.constant 0 : index
      %13 = vector.load %arg7[%c0_11, %c0_12] : memref<16x96xf32, #tpu.memory_space<vmem>>, vector<16x96xf32>
      tpu.vector_store %arg7[%c0_11, %c0_12], %12 {strides = array<i32>} : memref<16x96xf32, #tpu.memory_space<vmem>>, vector<16x96xf32>,
    } else {
    }
    %c0 = arith.constant 0 : index
    %c0_1 = arith.constant 0 : index
    %3 = vector.load %arg7[%c0, %c0_1] : memref<16x96xf32, #tpu.memory_space<vmem>>, vector<16x96xf32>
    %c0_2 = arith.constant 0 : index
    %c0_3 = arith.constant 0 : index
    %4 = vector.load %arg3[%c0_2, %c0_3] : memref<16x32xbf16, #tpu.memory_space<vmem>>, vector<16x32xbf16>
    %c0_4 = arith.constant 0 : index
    %c0_5 = arith.constant 0 : index
    %5 = vector.load %arg4[%c0_4, %c0_5] : memref<32x96xbf16, #tpu.memory_space<vmem>>, vector<32x96xbf16>
    %cst = arith.constant dense<0.000000e+00> : vector<16x96xf32>
    %6 = tpu.matmul %4, %5, %cst {dimension_numbers = #tpu.dot_dimension_numbers<[1], [0], [0], [1], [0, 0, 1, 1], [], []>} : vector<16x32xbf16>, vector<32x96xbf16>, vector<16x96xf32> -> vector<16x96xf32>
    %7 = arith.addf %3, %6 : vector<16x96xf32>
    %c0_6 = arith.constant 0 : index
    %c0_7 = arith.constant 0 : index
    %8 = vector.load %arg7[%c0_6, %c0_7] : memref<16x96xf32, #tpu.memory_space<vmem>>, vector<16x96xf32>
    tpu.vector_store %arg7[%c0_6, %c0_7], %7 {strides = array<i32>} : memref<16x96xf32, #tpu.memory_space<vmem>>, vector<16x96xf32>,
    %c0_i32_8 = arith.constant 0 : i32
    %9 = arith.cmpi eq, %arg2, %c0_i32_8 : i32
    %10 = arith.extui %9 : i1 to i32
    %c0_i32_9 = arith.constant 0 : i32
    %11 = arith.cmpi ne, %10, %c0_i32_9 : i32
    scf.if %11 {
      %c0_10 = arith.constant 0 : index
      %c0_11 = arith.constant 0 : index
      %12 = vector.load %arg7[%c0_10, %c0_11] : memref<16x96xf32, #tpu.memory_space<vmem>>, vector<16x96xf32>
      %c0_12 = arith.constant 0 : index
      %c0_13 = arith.constant 0 : index
      %13 = vector.load %arg5[%c0_12, %c0_13] : memref<1x96xf32, #tpu.memory_space<vmem>>, vector<1x96xf32>
      %14 = vector.broadcast %13 : vector<1x96xf32> to vector<16x96xf32>
      %15 = arith.addf %12, %14 : vector<16x96xf32>
      %16 = arith.truncf %15 : vector<16x96xf32> to vector<16x96xbf16>
      %c0_14 = arith.constant 0 : index
      %c0_15 = arith.constant 0 : index
      %17 = vector.load %arg6[%c0_14, %c0_15] : memref<16x96xbf16, #tpu.memory_space<vmem>>, vector<16x96xbf16>
      tpu.vector_store %arg6[%c0_14, %c0_15], %16 {strides = array<i32>} : memref<16x96xbf16, #tpu.memory_space<vmem>>, vector<16x96xbf16>,
    } else {
    }
    return
  }
  func.func @transform_0(%arg0: i32, %arg1: i32, %arg2: i32) -> (i32, i32) {
    %c0_i32 = arith.constant 0 : i32
    return %arg0, %arg2 : i32, i32
  }
  func.func @transform_1(%arg0: i32, %arg1: i32, %arg2: i32) -> (i32, i32) {
    %c0_i32 = arith.constant 0 : i32
    return %arg2, %arg1 : i32, i32
  }
  func.func @transform_2(%arg0: i32, %arg1: i32, %arg2: i32) -> (i32, i32) {
    %c0_i32 = arith.constant 0 : i32
    %c0_i32_0 = arith.constant 0 : i32
    return %c0_i32, %arg1 : i32, i32
  }
  func.func @transform_3(%arg0: i32, %arg1: i32, %arg2: i32) -> (i32, i32) {
    %c0_i32 = arith.constant 0 : i32
    return %arg0, %arg1 : i32, i32
  }
}

module attributes {stable_mosaic.version = 11 : i64} {
  func.func @_attn_kernel(%arg0: i32, %arg1: i32, %arg2: memref<2x8x96xbf16, #tpu.memory_space<vmem>>, %arg3: memref<2x8x96xbf16, #tpu.memory_space<vmem>>, %arg4: memref<32x32xbf16, #tpu.memory_space<vmem>>, %arg5: memref<1x32xf32, #tpu.memory_space<vmem>>, %arg6: memref<2x8x32xf32, #tpu.memory_space<vmem>>, %arg7: memref<2x4x8xf32, #tpu.memory_space<vmem>>) attributes {dimension_semantics = [#tpu.dimension_semantics<parallel>, #tpu.dimension_semantics<arbitrary>], iteration_bounds = array<i64: 1, 1>, scalar_prefetch = 0 : i64, scratch_operands = 0 : i64, tpu.core_type = #tpu.core_type<tc>, window_params = [{transform_indices = @transform_0, window_bounds = array<i64: 2, 8, 96>}, {transform_indices = @transform_1, window_bounds = array<i64: 2, 8, 96>}, {pipeline_mode = #tpu.pipeline_mode<synchronous>, transform_indices = @transform_2, window_bounds = array<i64: 32, 32>}, {pipeline_mode = #tpu.pipeline_mode<synchronous>, transform_indices = @transform_3, window_bounds = array<i64: 1, 32>}, {transform_indices = @transform_4, window_bounds = array<i64: 2, 8, 32>}, {transform_indices = @transform_5, window_bounds = array<i64: 2, 4, 8>}]} {
    %c0_i32 = arith.constant 0 : i32
    %0 = arith.cmpi eq, %arg1, %c0_i32 : i32
    %1 = arith.extui %0 : i1 to i32
    %c0_i32_0 = arith.constant 0 : i32
    %2 = arith.cmpi ne, %1, %c0_i32_0 : i32
    scf.if %2 {
      %cst_87 = arith.constant 0.000000e+00 : f32
      %117 = vector.broadcast %cst_87 : f32 to vector<2x4x8xf32>
      %c0_88 = arith.constant 0 : index
      %c0_89 = arith.constant 0 : index
      %c0_90 = arith.constant 0 : index
      %118 = vector.load %arg7[%c0_88, %c0_89, %c0_90] : memref<2x4x8xf32, #tpu.memory_space<vmem>>, vector<2x4x8xf32>
      tpu.vector_store %arg7[%c0_88, %c0_89, %c0_90], %117 {strides = array<i32>} : memref<2x4x8xf32, #tpu.memory_space<vmem>>, vector<2x4x8xf32>,
    } else {
    }
    %cst = arith.constant 0.000000e+00 : f32
    %3 = vector.broadcast %cst : f32 to vector<2x8x32xf32>
    %c0 = arith.constant 0 : index
    %c0_1 = arith.constant 0 : index
    %c0_2 = arith.constant 0 : index
    %4 = vector.load %arg2[%c0, %c0_1, %c0_2] : memref<2x8x96xbf16, #tpu.memory_space<vmem>>, vector<2x8x8xbf16>
    %c0_3 = arith.constant 0 : index
    %c0_4 = arith.constant 0 : index
    %c32 = arith.constant 32 : index
    %5 = vector.load %arg3[%c0_3, %c0_4, %c32] : memref<2x8x96xbf16, #tpu.memory_space<vmem>>, vector<2x8x8xbf16>
    %c0_5 = arith.constant 0 : index
    %c0_6 = arith.constant 0 : index
    %c64 = arith.constant 64 : index
    %6 = vector.load %arg3[%c0_5, %c0_6, %c64] : memref<2x8x96xbf16, #tpu.memory_space<vmem>>, vector<2x8x8xbf16>
    "tpu.trace_start"() <{level = 10 : i32, message = "bqd,bkd->bqk"}> : () -> ()
    %cst_7 = arith.constant dense<0.000000e+00> : vector<2x8x8xf32>
    %7 = tpu.matmul %4, %5, %cst_7 {dimension_numbers = #tpu.dot_dimension_numbers<[2], [2], [1], [1], [0, 0, 0, 1, 1, 1], [0], [0]>} : vector<2x8x8xbf16>, vector<2x8x8xbf16>, vector<2x8x8xf32> -> vector<2x8x8xf32>
    "tpu.trace_stop"() : () -> ()
    %cst_8 = arith.constant dense<0xFF800000> : vector<2x8xf32>
    %8 = vector.multi_reduction <maximumf>, %7, %cst_8 [2] : vector<2x8x8xf32> to vector<2x8xf32>
    %9 = vector.shape_cast %8 : vector<2x8xf32> to vector<2x8x1xf32>
    %10 = vector.broadcast %9 : vector<2x8x1xf32> to vector<2x8x8xf32>
    %11 = arith.subf %7, %10 : vector<2x8x8xf32>
    %12 = math.exp %11 : vector<2x8x8xf32>
    %cst_9 = arith.constant dense<0.000000e+00> : vector<2x8xf32>
    %13 = vector.multi_reduction <add>, %12, %cst_9 [2] : vector<2x8x8xf32> to vector<2x8xf32>
    %14 = vector.shape_cast %13 : vector<2x8xf32> to vector<2x8x1xf32>
    %15 = tpu.reciprocal %14 {approx = true} : vector<2x8x1xf32> -> vector<2x8x1xf32>
    %16 = vector.broadcast %15 : vector<2x8x1xf32> to vector<2x8x8xf32>
    %17 = arith.mulf %12, %16 : vector<2x8x8xf32>
    %c0_10 = arith.constant 0 : index
    %c0_11 = arith.constant 0 : index
    %c0_12 = arith.constant 0 : index
    %18 = vector.load %arg7[%c0_10, %c0_11, %c0_12] : memref<2x4x8xf32, #tpu.memory_space<vmem>>, vector<2x1x8xf32>
    %cst_13 = arith.constant dense<0.000000e+00> : vector<2x8xf32>
    %19 = vector.multi_reduction <add>, %17, %cst_13 [1] : vector<2x8x8xf32> to vector<2x8xf32>
    %20 = vector.shape_cast %19 : vector<2x8xf32> to vector<2x1x8xf32>
    %cst_14 = arith.constant 1.250000e-01 : f32
    %21 = vector.broadcast %cst_14 : f32 to vector<2x1x8xf32>
    %22 = arith.mulf %20, %21 : vector<2x1x8xf32>
    %23 = arith.addf %18, %22 : vector<2x1x8xf32>
    %c0_15 = arith.constant 0 : index
    %c0_16 = arith.constant 0 : index
    %c0_17 = arith.constant 0 : index
    %24 = vector.load %arg7[%c0_15, %c0_16, %c0_17] : memref<2x4x8xf32, #tpu.memory_space<vmem>>, vector<2x1x8xf32>
    tpu.vector_store %arg7[%c0_15, %c0_16, %c0_17], %23 {strides = array<i32>} : memref<2x4x8xf32, #tpu.memory_space<vmem>>, vector<2x1x8xf32>,
    %25 = arith.truncf %17 : vector<2x8x8xf32> to vector<2x8x8xbf16>
    "tpu.trace_start"() <{level = 10 : i32, message = "bqk,bkd->bqd"}> : () -> ()
    %cst_18 = arith.constant dense<0.000000e+00> : vector<2x8x8xf32>
    %26 = tpu.matmul %25, %6, %cst_18 {dimension_numbers = #tpu.dot_dimension_numbers<[2], [1], [1], [2], [0, 0, 0, 1, 1, 2], [0], [0]>} : vector<2x8x8xbf16>, vector<2x8x8xbf16>, vector<2x8x8xf32> -> vector<2x8x8xf32>
    "tpu.trace_stop"() : () -> ()
    %27 = arith.truncf %26 : vector<2x8x8xf32> to vector<2x8x8xbf16>
    %c0_19 = arith.constant 0 : index
    %c0_20 = arith.constant 0 : index
    %28 = vector.load %arg4[%c0_19, %c0_20] : memref<32x32xbf16, #tpu.memory_space<vmem>>, vector<8x32xbf16>
    "tpu.trace_start"() <{level = 10 : i32, message = "bqh,hd->bqd"}> : () -> ()
    %cst_21 = arith.constant dense<0.000000e+00> : vector<2x8x32xf32>
    %29 = tpu.matmul %27, %28, %cst_21 {dimension_numbers = #tpu.dot_dimension_numbers<[2], [0], [0, 1], [1], [0, 0, 0, 1, 1, 1], [], []>} : vector<2x8x8xbf16>, vector<8x32xbf16>, vector<2x8x32xf32> -> vector<2x8x32xf32>
    "tpu.trace_stop"() : () -> ()
    %30 = arith.addf %3, %29 : vector<2x8x32xf32>
    %c0_22 = arith.constant 0 : index
    %c0_23 = arith.constant 0 : index
    %c8 = arith.constant 8 : index
    %31 = vector.load %arg2[%c0_22, %c0_23, %c8] : memref<2x8x96xbf16, #tpu.memory_space<vmem>>, vector<2x8x8xbf16>
    %c0_24 = arith.constant 0 : index
    %c0_25 = arith.constant 0 : index
    %c40 = arith.constant 40 : index
    %32 = vector.load %arg3[%c0_24, %c0_25, %c40] : memref<2x8x96xbf16, #tpu.memory_space<vmem>>, vector<2x8x8xbf16>
    %c0_26 = arith.constant 0 : index
    %c0_27 = arith.constant 0 : index
    %c72 = arith.constant 72 : index
    %33 = vector.load %arg3[%c0_26, %c0_27, %c72] : memref<2x8x96xbf16, #tpu.memory_space<vmem>>, vector<2x8x8xbf16>
    "tpu.trace_start"() <{level = 10 : i32, message = "bqd,bkd->bqk"}> : () -> ()
    %cst_28 = arith.constant dense<0.000000e+00> : vector<2x8x8xf32>
    %34 = tpu.matmul %31, %32, %cst_28 {dimension_numbers = #tpu.dot_dimension_numbers<[2], [2], [1], [1], [0, 0, 0, 1, 1, 1], [0], [0]>} : vector<2x8x8xbf16>, vector<2x8x8xbf16>, vector<2x8x8xf32> -> vector<2x8x8xf32>
    "tpu.trace_stop"() : () -> ()
    %cst_29 = arith.constant dense<0xFF800000> : vector<2x8xf32>
    %35 = vector.multi_reduction <maximumf>, %34, %cst_29 [2] : vector<2x8x8xf32> to vector<2x8xf32>
    %36 = vector.shape_cast %35 : vector<2x8xf32> to vector<2x8x1xf32>
    %37 = vector.broadcast %36 : vector<2x8x1xf32> to vector<2x8x8xf32>
    %38 = arith.subf %34, %37 : vector<2x8x8xf32>
    %39 = math.exp %38 : vector<2x8x8xf32>
    %cst_30 = arith.constant dense<0.000000e+00> : vector<2x8xf32>
    %40 = vector.multi_reduction <add>, %39, %cst_30 [2] : vector<2x8x8xf32> to vector<2x8xf32>
    %41 = vector.shape_cast %40 : vector<2x8xf32> to vector<2x8x1xf32>
    %42 = tpu.reciprocal %41 {approx = true} : vector<2x8x1xf32> -> vector<2x8x1xf32>
    %43 = vector.broadcast %42 : vector<2x8x1xf32> to vector<2x8x8xf32>
    %44 = arith.mulf %39, %43 : vector<2x8x8xf32>
    %c0_31 = arith.constant 0 : index
    %c1 = arith.constant 1 : index
    %c0_32 = arith.constant 0 : index
    %45 = vector.load %arg7[%c0_31, %c1, %c0_32] : memref<2x4x8xf32, #tpu.memory_space<vmem>>, vector<2x1x8xf32>
    %cst_33 = arith.constant dense<0.000000e+00> : vector<2x8xf32>
    %46 = vector.multi_reduction <add>, %44, %cst_33 [1] : vector<2x8x8xf32> to vector<2x8xf32>
    %47 = vector.shape_cast %46 : vector<2x8xf32> to vector<2x1x8xf32>
    %cst_34 = arith.constant 1.250000e-01 : f32
    %48 = vector.broadcast %cst_34 : f32 to vector<2x1x8xf32>
    %49 = arith.mulf %47, %48 : vector<2x1x8xf32>
    %50 = arith.addf %45, %49 : vector<2x1x8xf32>
    %c0_35 = arith.constant 0 : index
    %c1_36 = arith.constant 1 : index
    %c0_37 = arith.constant 0 : index
    %51 = vector.load %arg7[%c0_35, %c1_36, %c0_37] : memref<2x4x8xf32, #tpu.memory_space<vmem>>, vector<2x1x8xf32>
    tpu.vector_store %arg7[%c0_35, %c1_36, %c0_37], %50 {strides = array<i32>} : memref<2x4x8xf32, #tpu.memory_space<vmem>>, vector<2x1x8xf32>,
    %52 = arith.truncf %44 : vector<2x8x8xf32> to vector<2x8x8xbf16>
    "tpu.trace_start"() <{level = 10 : i32, message = "bqk,bkd->bqd"}> : () -> ()
    %cst_38 = arith.constant dense<0.000000e+00> : vector<2x8x8xf32>
    %53 = tpu.matmul %52, %33, %cst_38 {dimension_numbers = #tpu.dot_dimension_numbers<[2], [1], [1], [2], [0, 0, 0, 1, 1, 2], [0], [0]>} : vector<2x8x8xbf16>, vector<2x8x8xbf16>, vector<2x8x8xf32> -> vector<2x8x8xf32>
    "tpu.trace_stop"() : () -> ()
    %54 = arith.truncf %53 : vector<2x8x8xf32> to vector<2x8x8xbf16>
    %c8_39 = arith.constant 8 : index
    %c0_40 = arith.constant 0 : index
    %55 = vector.load %arg4[%c8_39, %c0_40] : memref<32x32xbf16, #tpu.memory_space<vmem>>, vector<8x32xbf16>
    "tpu.trace_start"() <{level = 10 : i32, message = "bqh,hd->bqd"}> : () -> ()
    %cst_41 = arith.constant dense<0.000000e+00> : vector<2x8x32xf32>
    %56 = tpu.matmul %54, %55, %cst_41 {dimension_numbers = #tpu.dot_dimension_numbers<[2], [0], [0, 1], [1], [0, 0, 0, 1, 1, 1], [], []>} : vector<2x8x8xbf16>, vector<8x32xbf16>, vector<2x8x32xf32> -> vector<2x8x32xf32>
    "tpu.trace_stop"() : () -> ()
    %57 = arith.addf %30, %56 : vector<2x8x32xf32>
    %c0_42 = arith.constant 0 : index
    %c0_43 = arith.constant 0 : index
    %c16 = arith.constant 16 : index
    %58 = vector.load %arg2[%c0_42, %c0_43, %c16] : memref<2x8x96xbf16, #tpu.memory_space<vmem>>, vector<2x8x8xbf16>
    %c0_44 = arith.constant 0 : index
    %c0_45 = arith.constant 0 : index
    %c48 = arith.constant 48 : index
    %59 = vector.load %arg3[%c0_44, %c0_45, %c48] : memref<2x8x96xbf16, #tpu.memory_space<vmem>>, vector<2x8x8xbf16>
    %c0_46 = arith.constant 0 : index
    %c0_47 = arith.constant 0 : index
    %c80 = arith.constant 80 : index
    %60 = vector.load %arg3[%c0_46, %c0_47, %c80] : memref<2x8x96xbf16, #tpu.memory_space<vmem>>, vector<2x8x8xbf16>
    "tpu.trace_start"() <{level = 10 : i32, message = "bqd,bkd->bqk"}> : () -> ()
    %cst_48 = arith.constant dense<0.000000e+00> : vector<2x8x8xf32>
    %61 = tpu.matmul %58, %59, %cst_48 {dimension_numbers = #tpu.dot_dimension_numbers<[2], [2], [1], [1], [0, 0, 0, 1, 1, 1], [0], [0]>} : vector<2x8x8xbf16>, vector<2x8x8xbf16>, vector<2x8x8xf32> -> vector<2x8x8xf32>
    "tpu.trace_stop"() : () -> ()
    %cst_49 = arith.constant dense<0xFF800000> : vector<2x8xf32>
    %62 = vector.multi_reduction <maximumf>, %61, %cst_49 [2] : vector<2x8x8xf32> to vector<2x8xf32>
    %63 = vector.shape_cast %62 : vector<2x8xf32> to vector<2x8x1xf32>
    %64 = vector.broadcast %63 : vector<2x8x1xf32> to vector<2x8x8xf32>
    %65 = arith.subf %61, %64 : vector<2x8x8xf32>
    %66 = math.exp %65 : vector<2x8x8xf32>
    %cst_50 = arith.constant dense<0.000000e+00> : vector<2x8xf32>
    %67 = vector.multi_reduction <add>, %66, %cst_50 [2] : vector<2x8x8xf32> to vector<2x8xf32>
    %68 = vector.shape_cast %67 : vector<2x8xf32> to vector<2x8x1xf32>
    %69 = tpu.reciprocal %68 {approx = true} : vector<2x8x1xf32> -> vector<2x8x1xf32>
    %70 = vector.broadcast %69 : vector<2x8x1xf32> to vector<2x8x8xf32>
    %71 = arith.mulf %66, %70 : vector<2x8x8xf32>
    %c0_51 = arith.constant 0 : index
    %c2 = arith.constant 2 : index
    %c0_52 = arith.constant 0 : index
    %72 = vector.load %arg7[%c0_51, %c2, %c0_52] : memref<2x4x8xf32, #tpu.memory_space<vmem>>, vector<2x1x8xf32>
    %cst_53 = arith.constant dense<0.000000e+00> : vector<2x8xf32>
    %73 = vector.multi_reduction <add>, %71, %cst_53 [1] : vector<2x8x8xf32> to vector<2x8xf32>
    %74 = vector.shape_cast %73 : vector<2x8xf32> to vector<2x1x8xf32>
    %cst_54 = arith.constant 1.250000e-01 : f32
    %75 = vector.broadcast %cst_54 : f32 to vector<2x1x8xf32>
    %76 = arith.mulf %74, %75 : vector<2x1x8xf32>
    %77 = arith.addf %72, %76 : vector<2x1x8xf32>
    %c0_55 = arith.constant 0 : index
    %c2_56 = arith.constant 2 : index
    %c0_57 = arith.constant 0 : index
    %78 = vector.load %arg7[%c0_55, %c2_56, %c0_57] : memref<2x4x8xf32, #tpu.memory_space<vmem>>, vector<2x1x8xf32>
    tpu.vector_store %arg7[%c0_55, %c2_56, %c0_57], %77 {strides = array<i32>} : memref<2x4x8xf32, #tpu.memory_space<vmem>>, vector<2x1x8xf32>,
    %79 = arith.truncf %71 : vector<2x8x8xf32> to vector<2x8x8xbf16>
    "tpu.trace_start"() <{level = 10 : i32, message = "bqk,bkd->bqd"}> : () -> ()
    %cst_58 = arith.constant dense<0.000000e+00> : vector<2x8x8xf32>
    %80 = tpu.matmul %79, %60, %cst_58 {dimension_numbers = #tpu.dot_dimension_numbers<[2], [1], [1], [2], [0, 0, 0, 1, 1, 2], [0], [0]>} : vector<2x8x8xbf16>, vector<2x8x8xbf16>, vector<2x8x8xf32> -> vector<2x8x8xf32>
    "tpu.trace_stop"() : () -> ()
    %81 = arith.truncf %80 : vector<2x8x8xf32> to vector<2x8x8xbf16>
    %c16_59 = arith.constant 16 : index
    %c0_60 = arith.constant 0 : index
    %82 = vector.load %arg4[%c16_59, %c0_60] : memref<32x32xbf16, #tpu.memory_space<vmem>>, vector<8x32xbf16>
    "tpu.trace_start"() <{level = 10 : i32, message = "bqh,hd->bqd"}> : () -> ()
    %cst_61 = arith.constant dense<0.000000e+00> : vector<2x8x32xf32>
    %83 = tpu.matmul %81, %82, %cst_61 {dimension_numbers = #tpu.dot_dimension_numbers<[2], [0], [0, 1], [1], [0, 0, 0, 1, 1, 1], [], []>} : vector<2x8x8xbf16>, vector<8x32xbf16>, vector<2x8x32xf32> -> vector<2x8x32xf32>
    "tpu.trace_stop"() : () -> ()
    %84 = arith.addf %57, %83 : vector<2x8x32xf32>
    %c0_62 = arith.constant 0 : index
    %c0_63 = arith.constant 0 : index
    %c24 = arith.constant 24 : index
    %85 = vector.load %arg2[%c0_62, %c0_63, %c24] : memref<2x8x96xbf16, #tpu.memory_space<vmem>>, vector<2x8x8xbf16>
    %c0_64 = arith.constant 0 : index
    %c0_65 = arith.constant 0 : index
    %c56 = arith.constant 56 : index
    %86 = vector.load %arg3[%c0_64, %c0_65, %c56] : memref<2x8x96xbf16, #tpu.memory_space<vmem>>, vector<2x8x8xbf16>
    %c0_66 = arith.constant 0 : index
    %c0_67 = arith.constant 0 : index
    %c88 = arith.constant 88 : index
    %87 = vector.load %arg3[%c0_66, %c0_67, %c88] : memref<2x8x96xbf16, #tpu.memory_space<vmem>>, vector<2x8x8xbf16>
    "tpu.trace_start"() <{level = 10 : i32, message = "bqd,bkd->bqk"}> : () -> ()
    %cst_68 = arith.constant dense<0.000000e+00> : vector<2x8x8xf32>
    %88 = tpu.matmul %85, %86, %cst_68 {dimension_numbers = #tpu.dot_dimension_numbers<[2], [2], [1], [1], [0, 0, 0, 1, 1, 1], [0], [0]>} : vector<2x8x8xbf16>, vector<2x8x8xbf16>, vector<2x8x8xf32> -> vector<2x8x8xf32>
    "tpu.trace_stop"() : () -> ()
    %cst_69 = arith.constant dense<0xFF800000> : vector<2x8xf32>
    %89 = vector.multi_reduction <maximumf>, %88, %cst_69 [2] : vector<2x8x8xf32> to vector<2x8xf32>
    %90 = vector.shape_cast %89 : vector<2x8xf32> to vector<2x8x1xf32>
    %91 = vector.broadcast %90 : vector<2x8x1xf32> to vector<2x8x8xf32>
    %92 = arith.subf %88, %91 : vector<2x8x8xf32>
    %93 = math.exp %92 : vector<2x8x8xf32>
    %cst_70 = arith.constant dense<0.000000e+00> : vector<2x8xf32>
    %94 = vector.multi_reduction <add>, %93, %cst_70 [2] : vector<2x8x8xf32> to vector<2x8xf32>
    %95 = vector.shape_cast %94 : vector<2x8xf32> to vector<2x8x1xf32>
    %96 = tpu.reciprocal %95 {approx = true} : vector<2x8x1xf32> -> vector<2x8x1xf32>
    %97 = vector.broadcast %96 : vector<2x8x1xf32> to vector<2x8x8xf32>
    %98 = arith.mulf %93, %97 : vector<2x8x8xf32>
    %c0_71 = arith.constant 0 : index
    %c3 = arith.constant 3 : index
    %c0_72 = arith.constant 0 : index
    %99 = vector.load %arg7[%c0_71, %c3, %c0_72] : memref<2x4x8xf32, #tpu.memory_space<vmem>>, vector<2x1x8xf32>
    %cst_73 = arith.constant dense<0.000000e+00> : vector<2x8xf32>
    %100 = vector.multi_reduction <add>, %98, %cst_73 [1] : vector<2x8x8xf32> to vector<2x8xf32>
    %101 = vector.shape_cast %100 : vector<2x8xf32> to vector<2x1x8xf32>
    %cst_74 = arith.constant 1.250000e-01 : f32
    %102 = vector.broadcast %cst_74 : f32 to vector<2x1x8xf32>
    %103 = arith.mulf %101, %102 : vector<2x1x8xf32>
    %104 = arith.addf %99, %103 : vector<2x1x8xf32>
    %c0_75 = arith.constant 0 : index
    %c3_76 = arith.constant 3 : index
    %c0_77 = arith.constant 0 : index
    %105 = vector.load %arg7[%c0_75, %c3_76, %c0_77] : memref<2x4x8xf32, #tpu.memory_space<vmem>>, vector<2x1x8xf32>
    tpu.vector_store %arg7[%c0_75, %c3_76, %c0_77], %104 {strides = array<i32>} : memref<2x4x8xf32, #tpu.memory_space<vmem>>, vector<2x1x8xf32>,
    %106 = arith.truncf %98 : vector<2x8x8xf32> to vector<2x8x8xbf16>
    "tpu.trace_start"() <{level = 10 : i32, message = "bqk,bkd->bqd"}> : () -> ()
    %cst_78 = arith.constant dense<0.000000e+00> : vector<2x8x8xf32>
    %107 = tpu.matmul %106, %87, %cst_78 {dimension_numbers = #tpu.dot_dimension_numbers<[2], [1], [1], [2], [0, 0, 0, 1, 1, 2], [0], [0]>} : vector<2x8x8xbf16>, vector<2x8x8xbf16>, vector<2x8x8xf32> -> vector<2x8x8xf32>
    "tpu.trace_stop"() : () -> ()
    %108 = arith.truncf %107 : vector<2x8x8xf32> to vector<2x8x8xbf16>
    %c24_79 = arith.constant 24 : index
    %c0_80 = arith.constant 0 : index
    %109 = vector.load %arg4[%c24_79, %c0_80] : memref<32x32xbf16, #tpu.memory_space<vmem>>, vector<8x32xbf16>
    "tpu.trace_start"() <{level = 10 : i32, message = "bqh,hd->bqd"}> : () -> ()
    %cst_81 = arith.constant dense<0.000000e+00> : vector<2x8x32xf32>
    %110 = tpu.matmul %108, %109, %cst_81 {dimension_numbers = #tpu.dot_dimension_numbers<[2], [0], [0, 1], [1], [0, 0, 0, 1, 1, 1], [], []>} : vector<2x8x8xbf16>, vector<8x32xbf16>, vector<2x8x32xf32> -> vector<2x8x32xf32>
    "tpu.trace_stop"() : () -> ()
    %111 = arith.addf %84, %110 : vector<2x8x32xf32>
    %c0_82 = arith.constant 0 : index
    %c0_83 = arith.constant 0 : index
    %112 = vector.load %arg5[%c0_82, %c0_83] : memref<1x32xf32, #tpu.memory_space<vmem>>, vector<1x32xf32>
    %113 = vector.shape_cast %112 : vector<1x32xf32> to vector<1x1x32xf32>
    %114 = vector.broadcast %113 : vector<1x1x32xf32> to vector<2x8x32xf32>
    %115 = arith.addf %111, %114 : vector<2x8x32xf32>
    %c0_84 = arith.constant 0 : index
    %c0_85 = arith.constant 0 : index
    %c0_86 = arith.constant 0 : index
    %116 = vector.load %arg6[%c0_84, %c0_85, %c0_86] : memref<2x8x32xf32, #tpu.memory_space<vmem>>, vector<2x8x32xf32>
    tpu.vector_store %arg6[%c0_84, %c0_85, %c0_86], %115 {strides = array<i32>} : memref<2x8x32xf32, #tpu.memory_space<vmem>>, vector<2x8x32xf32>,
    return
  }
  func.func @transform_0(%arg0: i32, %arg1: i32) -> (i32, i32, i32) {
    %c0_i32 = arith.constant 0 : i32
    %c0_i32_0 = arith.constant 0 : i32
    return %arg0, %arg1, %c0_i32 : i32, i32, i32
  }
  func.func @transform_1(%arg0: i32, %arg1: i32) -> (i32, i32, i32) {
    %c0_i32 = arith.constant 0 : i32
    %c0_i32_0 = arith.constant 0 : i32
    %c0_i32_1 = arith.constant 0 : i32
    return %arg0, %c0_i32, %c0_i32_0 : i32, i32, i32
  }
  func.func @transform_2(%arg0: i32, %arg1: i32) -> (i32, i32) {
    %c0_i32 = arith.constant 0 : i32
    %c0_i32_0 = arith.constant 0 : i32
    %c0_i32_1 = arith.constant 0 : i32
    return %c0_i32, %c0_i32_0 : i32, i32
  }
  func.func @transform_3(%arg0: i32, %arg1: i32) -> (i32, i32) {
    %c0_i32 = arith.constant 0 : i32
    %c0_i32_0 = arith.constant 0 : i32
    %c0_i32_1 = arith.constant 0 : i32
    return %c0_i32, %c0_i32_0 : i32, i32
  }
  func.func @transform_4(%arg0: i32, %arg1: i32) -> (i32, i32, i32) {
    %c0_i32 = arith.constant 0 : i32
    %c0_i32_0 = arith.constant 0 : i32
    return %arg0, %arg1, %c0_i32 : i32, i32, i32
  }
  func.func @transform_5(%arg0: i32, %arg1: i32) -> (i32, i32, i32) {
    %c0_i32 = arith.constant 0 : i32
    %c0_i32_0 = arith.constant 0 : i32
    %c0_i32_1 = arith.constant 0 : i32
    return %arg0, %c0_i32, %c0_i32_0 : i32, i32, i32
  }
}

</mosaic_0001>

<bundles_post_ra>
// kernel: core_token_attention_forward.2
= control target key start
LH: loop header
LB: loop body
LE: loop exit
PB: predicated region body
PF: predicated region fallthrough
CT: control target
= control target key end

     0   :  { %vm19_vm0 = vcmask 785408   ;;  %v151_v0 = vmov 0.0   ;;  %vm152_vm1 = vmmov 0   ;;  %vm47_vm2 = vcmask 261120   ;;  %s195_s1 = inlined_call_operand.vmem [shape: bf16[32,96], index: 1, kind: input, shape index: {}]   ;;  %s196_s0 = inlined_call_operand.vmem [shape: bf16[16,32], index: 0, kind: input, shape index: {}]   ;;  %s197_s2 = inlined_call_operand.vmem [shape: f32[1,96], index: 2, kind: input, shape index: {}]   ;;  %s198_s3 = inlined_call_operand.vmem [shape: bf16[16,96], index: 3, kind: output, shape index: {}]  }
   0x1   :  { %138 = vmatprep.subr.bf16.mxu0 %v151_v0  ;;  %v148_v1 = vld [vmem:[%s195_s1] sm:$0xff]   ;;  %142 = vmatprep.mubr.msk.bf16.mxu0 %vm152_vm1, %v151_v0  ;;  %20 = vst.msk [vmem:[#allocation2] sm:$0xff] %vm19_vm0, %v151_v0  ;;  %21 = vst.msk [vmem:[#allocation2 + $0x8] sm:$0xff] %vm19_vm0, %v151_v0  ;;  %v149_v2 = vld [vmem:[%s195_s1 + $0x8] sm:$0xff]   ;;  %vm119_vm3 = vcmask 781312  }
   0x2   :  { %139 = vmatpush3.bf16.msra.mxu0 %v148_v1  ;;  %v150_v3 = vld [vmem:[%s196_s0] sm:$0xff]  }
   0x3   :  { %140 = vmatprep.subr.bf16.mxu0 %v151_v0  ;;  %v130_v12 = vld [vmem:[%s197_s2] ss:$0 sm:$0xff] }
   0x6   :  { %141 = vmatpush3.bf16.msra.mxu0 %v149_v2 }
   0x8   :  { %v22_v4 = vld [vmem:[#allocation2] sm:$0xff]  ;;  %v23_v6 = vld [vmem:[#allocation2 + $0x8] sm:$0xff] }
   0x9   :  { %143 = vmatmul.mubr.msk.bf16.vlgmr.msra.gmra.mrb[0].mxu0 %vm47_vm2, %v150_v3 }
  0xdc   :  { %v85_v5 = vpop.f32.mrb[0].mxu0 }
  0xdd   :  { %v92_v7 = vadd.f32 %v85_v5, %v22_v4  ;;  %v144_v8 = vpop.f32.mrb[1].mxu0 }
  0xde   :  { %v88_v9 = vpop.f32.mrb[2].mxu0 }
  0xdf   :  { %95 = vst.msk [vmem:[#allocation2] sm:$0xff] %vm19_vm0, %v92_v7  ;;  %v93_v10 = vadd.f32 %v88_v9, %v23_v6  ;;  %v145_v11 = vpop.f32.mrb[3].mxu0 }
  0xe1   :  { %96 = vst.msk [vmem:[#allocation2 + $0x8] sm:$0xff] %vm19_vm0, %v93_v10 }
  0xe6   :  { %v100_v13 = vld [vmem:[#allocation2] sm:$0xff] }
  0xe7   :  { %v109_v14 = vadd.f32 %v130_v12, %v100_v13 }
  0xe8   :  { %v101_v15 = vld [vmem:[#allocation2 + $0x8] sm:$0xff] }
  0xe9   :  { %v133_v16 = vpack.c.bf16 %v109_v14, %v109_v14  ;;  %v110_v17 = vadd.f32 %v130_v12, %v101_v15 }
  0xeb   :  { %120 = vst.msk [vmem:[%s198_s3] sm:$0xf] %vm119_vm3, %v133_v16  ;;  %v134_v18 = vpack.c.bf16 %v110_v17, %v110_v17 }
  0xed   :  { %121 = vst.msk [vmem:[%s198_s3 + $0x4] sm:$0xf] %vm119_vm3, %v134_v18 }

// kernel: core_token_attention_forward.3
= control target key start
LH: loop header
LB: loop body
LE: loop exit
PB: predicated region body
PF: predicated region fallthrough
CT: control target
= control target key end

     0   :  { %v1598_v1 = vmov 0.0   ;;  %s1599_s20 = smov 96   ;;  %vm1600_vm0 = vmmov 0   ;;  %s1958_s0 = inlined_call_operand.vmem [shape: bf16[2,8,96], index: 0, kind: input, shape index: {}, may-alias: {0,1}]   ;;  %s1959_s1 = inlined_call_operand.vmem [shape: bf16[2,8,96], index: 1, kind: input, shape index: {}, may-alias: {0,1}]   ;;  %s1960_s2 = inlined_call_operand.vmem [shape: bf16[32,32], index: 2, kind: input, shape index: {}]   ;;  %s1961_s3 = inlined_call_operand.vmem [shape: f32[1,32], index: 3, kind: input, shape index: {}]   ;;  %s1962_s4 = inlined_call_operand.hbm [shape: f32[2,8,32], index: 4, kind: output, shape index: {0}]   ;;  %s1963_s5 = inlined_call_operand.vmem [shape: f32[2,4,8], index: 5, kind: output, shape index: {1}]  }
   0x1   :  { %v1528_v0 = vld [vmem:[%s1959_s1] ss:$0 sps:$4 sm:$0xff]   ;;  %1392 = vmatprep.subr.bf16.mxu0 %v1598_v1  ;;  %1398 = vmatprep.subr.bf16.mxu1 %v1598_v1  ;;  %v1529_v2 = vld [vmem:[%s1959_s1 + $0x4] ss:$0 sps:$4 sm:$0xff]  }
   0x2   :  { %35 = vrot.lane.b32.xlu0 %v1528_v0, %s1599_s20  ;;  %1394 = vmatprep.mubr.msk.bf16.mxu0 %vm1600_vm0, %v1598_v1 }
   0x3   :  { %1400 = vmatprep.mubr.msk.bf16.mxu1 %vm1600_vm0, %v1598_v1 }
   0x6   :  { %87 = vrot.lane.b32.xlu0 %v1529_v2, %s1599_s20 }
   0x7   :  { %11 = vsyncpa [#allocation3], 0  ;;  %vm37_vm1 = vcmask 64512   ;;  %v28_v7 = vld [vmem:[%s1958_s0] sm:$0xf]  ;;  %s1601_s27 = smov 64  }
   0x8   :  { %v29_v8 = vld [vmem:[%s1958_s0 + $0x4] sm:$0xf]  ;;  %v1677_v19 = vld [vmem:[%s1959_s1] ss:$0 sps:$4 sm:$0xff]   ;;  %s1602_s30 = smov 88   ;;  %vm187_vm2 = vcmask 1043456  }
   0x9   :  { %vm25_vm3 = vcmask 60416   ;;  %v1698_v34 = vld [vmem:[%s1959_s1 + $0x4] ss:$0 sps:$4 sm:$0xff]   ;;  %v1532_v35 = vld [vmem:[%s1958_s0] ss:$0 sps:$4 sm:$0xff]   ;;  %s1603_s16 = smov 120  }
   0xa   :  { %26 = vst.msk [vmem:[%s1963_s5] sm:$0xf] %vm25_vm3, %v1598_v1  ;;  %27 = vst.msk [vmem:[%s1963_s5 + $0x4] sm:$0xf] %vm25_vm3, %v1598_v1  ;;  %v1533_v36 = vld [vmem:[%s1958_s0 + $0x4] ss:$0 sps:$4 sm:$0xff]  }
   0xb   :  { %vm177_vm4 = vcmask 57344   ;;  %s1604_s25 = smov 56   ;;  %s1605_s28 = smov 80   ;;  %vm1286_vm5 = vcmask 261120  }
   0xc   :  { %s1606_s8 = smov 112   ;;  %s1607_s23 = smov 48  }
   0xd   :  { %s1608_s26 = smov 72   ;;  %s1610_s17 = smov 40  }
  0x11   :  { %v157_v63 = vld [vmem:[%s1963_s5] sm:$0x1] }
  0x74   :  { %v36_v3 = vpop.permute.xlu0 %35 }
  0x75   :  { %v42_v4 = vsel %vm37_vm1, %v36_v3, 0 }
  0x76   :  { %1393 = vmatpush3.bf16.xpose.msra.mxu0 %v42_v4 }
  0x77   :  { %1404 = vmatprep.subr.bf16.mxu0 %v1598_v1 }
  0x78   :  { %v88_v5 = vpop.permute.xlu0 %87 }
  0x79   :  { %v93_v6 = vsel %vm37_vm1, %v88_v5, 0  ;;  %v158_v5 = vld [vmem:[%s1963_s5 + $0x4] sm:$0x1] }
  0x7a   :  { %1399 = vmatpush3.bf16.xpose.msra.mxu1 %v93_v6 }
  0x7b   :  { %1410 = vmatprep.subr.bf16.mxu1 %v1598_v1 }
  0x7d   :  { %1395 = vmatmul.mubr.msk.bf16.vlgmr.msra.gmra.mrb[0].mxu0 %vm37_vm1, %v28_v7 }
  0x7e   :  { %1406 = vmatprep.mubr.msk.bf16.mxu0 %vm1600_vm0, %v1598_v1 }
  0x81   :  { %1401 = vmatmul.mubr.msk.bf16.vlgmr.msra.gmra.mrb[0].mxu1 %vm37_vm1, %v29_v8 }
  0x82   :  { %1412 = vmatprep.mubr.msk.bf16.mxu1 %vm1600_vm0, %v1598_v1 }
 0x150   :  { %v78_v9 = vpop.f32.mrb[0].mxu0 }
 0x151   :  { %v1396_v10 = vpop.f32.mrb[1].mxu0  ;;  %v135_v11 = vsel %vm37_vm1, %v78_v9, -inf }
 0x152   :  { %136 = vmax.xlane.f32.xlu1 %v135_v11  ;;  %v81_v12 = vpop.f32.mrb[2].mxu0 }
 0x153   :  { %v1397_v13 = vpop.f32.mrb[3].mxu0 }
 0x154   :  { %v129_v14 = vpop.f32.mrb[0].mxu1 }
 0x155   :  { %v1402_v15 = vpop.f32.mrb[1].mxu1  ;;  %v138_v16 = vsel %vm37_vm1, %v129_v14, -inf }
 0x156   :  { %v132_v17 = vpop.f32.mrb[2].mxu1  ;;  %139 = vmax.xlane.f32.xlu1 %v138_v16 }
 0x157   :  { %v1403_v18 = vpop.f32.mrb[3].mxu1 }
 0x167   :  { %182 = vrot.lane.b32.xlu1 %v1528_v0, %s1601_s27 }
 0x16b   :  { %231 = vrot.lane.b32.xlu1 %v1529_v2, %s1601_s27 }
 0x16f   :  { %294 = vrot.lane.b32.xlu1 %v1677_v19, %s1602_s30 }
 0x1df   :  { %v137_v20 = vpop.xlane.xlu1 %136 }
 0x1e0   :  { %v141_v21 = vsub.f32 %v78_v9, %v137_v20 }
 0x1e2   :  { %v143_v22 = vmul.f32 1.442695, %v141_v21 }
 0x1e3   :  { %v140_v23 = vpop.xlane.xlu1 %139 }
 0x1e4   :  { %1542 = vpow2.f32 %v143_v22  ;;  %v142_v24 = vsub.f32 %v129_v14, %v140_v23 }
 0x1e6   :  { %v145_v25 = vmul.f32 1.442695, %v142_v24 }
 0x1e7   :  { %v183_v26 = vpop.permute.xlu1 %182 }
 0x1e8   :  { %1544 = vpow2.f32 %v145_v25  ;;  %v189_v27 = vsel %vm187_vm2, %v183_v26, 0 }
 0x1e9   :  { %1405 = vmatpush3.bf16.msra.mxu0 %v189_v27 }
 0x1ea   :  { %1416 = vmatprep.subr.bf16.mxu0 %v1598_v1 }
 0x1eb   :  { %v232_v28 = vpop.permute.xlu1 %231 }
 0x1ec   :  { %v237_v29 = vsel %vm187_vm2, %v232_v28, 0 }
 0x1ed   :  { %1411 = vmatpush3.bf16.msra.mxu1 %v237_v29 }
 0x1ee   :  { %v1543_v30 = vpop.eup %1542  ;;  %1422 = vmatprep.subr.bf16.mxu1 %v1598_v1 }
 0x1ef   :  { %v147_v31 = vsel %vm37_vm1, %v1543_v30, 0.0  ;;  %v295_v37 = vpop.permute.xlu1 %294 }
 0x1f0   :  { %148 = vadd.xlane.f32.xlu0 %v147_v31  ;;  %v300_v47 = vsel %vm37_vm1, %v295_v37, 0 }
 0x1f2   :  { %v1545_v32 = vpop.eup %1544 }
 0x1f3   :  { %v150_v33 = vsel %vm37_vm1, %v1545_v32, 0.0 }
 0x1f4   :  { %151 = vadd.xlane.f32.xlu1 %v150_v33 }
 0x205   :  { %350 = vrot.lane.b32.xlu1 %v1698_v34, %s1602_s30 }
 0x206   :  { %289 = vrot.lane.b32.xlu0 %v1532_v35, %s1603_s16 }
 0x209   :  { %345 = vrot.lane.b32.xlu1 %v1533_v36, %s1603_s16 }
 0x27d   :  { %v149_v38 = vpop.xlane.xlu0 %148 }
 0x27e   :  { %1546 = vrcp.f32 %v149_v38 }
 0x281   :  { %v152_v39 = vpop.xlane.xlu1 %151  ;;  %v290_v57 = vpop.permute.xlu0 %289 }
 0x282   :  { %1548 = vrcp.f32 %v152_v39  ;;  %v1761_v39 = vld [vmem:[%s1959_s1 + $0x4] ss:$0 sps:$4 sm:$0xff]  }
 0x285   :  { %v351_v46 = vpop.permute.xlu1 %350 }
 0x286   :  { %v356_v51 = vsel %vm37_vm1, %v351_v46, 0 }
 0x288   :  { %v1547_v40 = vpop.eup %1546 }
 0x289   :  { %v155_v41 = vmul.f32 %v1547_v40, %v1543_v30  ;;  %v346_v62 = vpop.permute.xlu1 %345  ;;  %v1536_v40 = vld [vmem:[%s1958_s0 + $0x4] ss:$0 sps:$4 sm:$0xff]  }
 0x28b   :  { %v159_v42 = vsel %vm37_vm1, %v155_v41, 0.0  ;;  %v180_v43 = vpack.c.bf16 %v155_v41, %v155_v41 }
 0x28c   :  { %v1549_v44 = vpop.eup %1548  ;;  %v160_v45 = vrot.slane %v159_v42, 4 }
 0x28d   :  { %v156_v48 = vmul.f32 %v1549_v44, %v1545_v32  ;;  %1407 = vmatmul.mubr.msk.bf16.vlgmr.msra.gmra.mrb[4].mxu0 %vm37_vm1, %v180_v43 }
 0x28e   :  { %v161_v49 = vadd.f32 %v160_v45, %v159_v42  ;;  %1417 = vmatpush3.bf16.xpose.msra.mxu0 %v300_v47  ;;  %1418 = vmatprep.mubr.msk.bf16.mxu0 %vm1600_vm0, %v1598_v1  ;;  %v1537_v42 = vld [vmem:[%s1958_s0] ss:$0 sps:$4 sm:$0xff]  }
 0x28f   :  { %v166_v50 = vsel %vm37_vm1, %v156_v48, 0.0  ;;  %v181_v52 = vpack.c.bf16 %v156_v48, %v156_v48  ;;  %1428 = vmatprep.subr.bf16.mxu0 %v1598_v1  ;;  %v542_v48 = vld [vmem:[%s1960_s2 + $0x4] sm:$0xf] }
 0x290   :  { %v162_v53 = vrot.slane %v161_v49, 2  ;;  %v167_v54 = vrot.slane %v166_v50, 4 }
 0x291   :  { %1413 = vmatmul.mubr.msk.bf16.vlgmr.msra.gmra.mrb[4].mxu1 %vm37_vm1, %v181_v52  ;;  %v552_v52 = vsel %vm187_vm2, %v542_v48, 0 }
 0x292   :  { %v163_v55 = vadd.f32 %v162_v53, %v161_v49  ;;  %v168_v56 = vadd.f32 %v167_v54, %v166_v50  ;;  %1423 = vmatpush3.bf16.xpose.msra.mxu1 %v356_v51  ;;  %1424 = vmatprep.mubr.msk.bf16.mxu1 %vm1600_vm0, %v1598_v1 }
 0x293   :  { %1434 = vmatprep.subr.bf16.mxu1 %v1598_v1 }
 0x294   :  { %v164_v58 = vrot.slane %v163_v55, 1  ;;  %v169_v59 = vrot.slane %v168_v56, 2 }
 0x295   :  { %1419 = vmatmul.mubr.msk.bf16.vlgmr.msra.gmra.mrb[8].mxu0 %vm37_vm1, %v290_v57 }
 0x296   :  { %v165_v60 = vadd.f32 %v164_v58, %v163_v55  ;;  %v170_v61 = vadd.f32 %v169_v59, %v168_v56  ;;  %1430 = vmatprep.mubr.msk.bf16.mxu0 %vm1600_vm0, %v1598_v1  ;;  %v281_v55 = vld [vmem:[%s1960_s2] sm:$0xf] }
 0x298   :  { %v173_v0 = vmul.f32 0.125, %v165_v60  ;;  %v171_v2 = vrot.slane %v170_v61, 1  ;;  %v604_v60 = vsel %vm187_vm2, %v281_v55, 0 }
 0x299   :  { %1425 = vmatmul.mubr.msk.bf16.vlgmr.msra.gmra.mrb[8].mxu1 %vm37_vm1, %v346_v62 }
 0x29a   :  { %v175_v3 = vadd.f32 %v173_v0, %v157_v63  ;;  %v172_v4 = vadd.f32 %v171_v2, %v170_v61  ;;  %1436 = vmatprep.mubr.msk.bf16.mxu1 %vm1600_vm0, %v1598_v1 }
 0x29c   :  { %178 = vst.msk [vmem:[%s1963_s5] sm:$0x1] %vm177_vm4, %v175_v3  ;;  %v174_v6 = vmul.f32 0.125, %v172_v4 }
 0x29e   :  { %v176_v7 = vadd.f32 %v174_v6, %v158_v5 }
 0x2a0   :  { %179 = vst.msk [vmem:[%s1963_s5 + $0x4] sm:$0x1] %vm177_vm4, %v176_v7 }
 0x360   :  { %v1740_v8 = vpop.f32.mrb[4].mxu0 }
 0x361   :  { %v1408_v9 = vpop.f32.mrb[5].mxu0 }
 0x362   :  { %v228_v10 = vpop.f32.mrb[6].mxu0  ;;  %v420_v9 = vld [vmem:[%s1963_s5 + $0x1] sm:$0x1] }
 0x363   :  { %v1409_v11 = vpop.f32.mrb[7].mxu0 }
 0x364   :  { %v1742_v12 = vpop.f32.mrb[4].mxu1 }
 0x365   :  { %v1349_v13 = vpack.c.bf16 %v1742_v12, %v1740_v8  ;;  %v1414_v14 = vpop.f32.mrb[5].mxu1 }
 0x366   :  { %v276_v15 = vpop.f32.mrb[6].mxu1 }
 0x367   :  { %v1415_v16 = vpop.f32.mrb[7].mxu1 }
 0x368   :  { %v336_v17 = vpop.f32.mrb[8].mxu0 }
 0x369   :  { %v1420_v18 = vpop.f32.mrb[9].mxu0  ;;  %v398_v20 = vsel %vm37_vm1, %v336_v17, -inf }
 0x36a   :  { %399 = vmax.xlane.f32.xlu1 %v398_v20  ;;  %v339_v21 = vpop.f32.mrb[10].mxu0 }
 0x36b   :  { %v1421_v22 = vpop.f32.mrb[11].mxu0 }
 0x36c   :  { %v392_v23 = vpop.f32.mrb[8].mxu1 }
 0x36d   :  { %v1426_v24 = vpop.f32.mrb[9].mxu1  ;;  %v401_v25 = vsel %vm37_vm1, %v392_v23, -inf }
 0x36e   :  { %402 = vmax.xlane.f32.xlu0 %v401_v25  ;;  %v395_v26 = vpop.f32.mrb[10].mxu1 }
 0x36f   :  { %v1427_v27 = vpop.f32.mrb[11].mxu1 }
 0x384   :  { %492 = vrot.lane.b32.xlu0 %v1698_v34, %s1604_s25  ;;  %v1755_v34 = vld [vmem:[%s1959_s1] ss:$0 sps:$4 sm:$0xff]  }
 0x388   :  { %654 = vrot.lane.b32.xlu0 %v1537_v42, %s1606_s8 }
 0x3f7   :  { %v400_v28 = vpop.xlane.xlu1 %399 }
 0x3f8   :  { %v404_v29 = vsub.f32 %v336_v17, %v400_v28  ;;  %v421_v17 = vld [vmem:[%s1963_s5 + $0x5] sm:$0x1] }
 0x3fa   :  { %v406_v30 = vmul.f32 1.442695, %v404_v29 }
 0x3fb   :  { %v403_v31 = vpop.xlane.xlu0 %402 }
 0x3fc   :  { %1550 = vpow2.f32 %v406_v30  ;;  %v405_v32 = vsub.f32 %v392_v23, %v403_v31 }
 0x3fe   :  { %v408_v33 = vmul.f32 1.442695, %v405_v32 }
 0x400   :  { %1552 = vpow2.f32 %v408_v33 }
 0x406   :  { %v1551_v35 = vpop.eup %1550 }
 0x407   :  { %v410_v36 = vsel %vm37_vm1, %v1551_v35, 0.0 }
 0x408   :  { %411 = vadd.xlane.f32.xlu1 %v410_v36 }
 0x40a   :  { %v1553_v37 = vpop.eup %1552 }
 0x40b   :  { %v413_v38 = vsel %vm37_vm1, %v1553_v37, 0.0 }
 0x40c   :  { %414 = vadd.xlane.f32.xlu1 %v413_v38 }
 0x41d   :  { %444 = vrot.lane.b32.xlu1 %v1677_v19, %s1604_s25  ;;  %v493_v19 = vpop.permute.xlu0 %492 }
 0x41e   :  { %v498_v41 = vsel %vm187_vm2, %v493_v19, 0 }
 0x41f   :  { %1435 = vmatpush3.bf16.msra.mxu1 %v498_v41 }
 0x420   :  { %1446 = vmatprep.subr.bf16.mxu1 %v1598_v1 }
 0x421   :  { %659 = vrot.lane.b32.xlu1 %v1755_v34, %s1605_s28  ;;  %v655_v30 = vpop.permute.xlu0 %654 }
 0x425   :  { %715 = vrot.lane.b32.xlu1 %v1761_v39, %s1605_s28 }
 0x429   :  { %710 = vrot.lane.b32.xlu1 %v1536_v40, %s1606_s8  ;;  %s1609_s8 = smov 104  }
 0x495   :  { %v412_v43 = vpop.xlane.xlu1 %411 }
 0x496   :  { %1554 = vrcp.f32 %v412_v43 }
 0x499   :  { %v415_v44 = vpop.xlane.xlu1 %414 }
 0x49a   :  { %1556 = vrcp.f32 %v415_v44 }
 0x49d   :  { %v445_v45 = vpop.permute.xlu1 %444 }
 0x49e   :  { %v450_v46 = vsel %vm187_vm2, %v445_v45, 0 }
 0x49f   :  { %1429 = vmatpush3.bf16.msra.mxu0 %v450_v46 }
 0x4a0   :  { %v1555_v47 = vpop.eup %1554  ;;  %1440 = vmatprep.subr.bf16.mxu0 %v1598_v1 }
 0x4a1   :  { %v418_v49 = vmul.f32 %v1555_v47, %v1551_v35  ;;  %v660_v61 = vpop.permute.xlu1 %659 }
 0x4a2   :  { %v665_v27 = vsel %vm37_vm1, %v660_v61, 0 }
 0x4a3   :  { %v422_v50 = vsel %vm37_vm1, %v418_v49, 0.0  ;;  %v442_v51 = vpack.c.bf16 %v418_v49, %v418_v49 }
 0x4a4   :  { %v1557_v53 = vpop.eup %1556  ;;  %v423_v54 = vrot.slane %v422_v50, 4 }
 0x4a5   :  { %v419_v56 = vmul.f32 %v1557_v53, %v1553_v37  ;;  %1431 = vmatmul.mubr.msk.bf16.vlgmr.msra.gmra.mrb[12].mxu0 %vm37_vm1, %v442_v51  ;;  %v716_v5 = vpop.permute.xlu1 %715 }
 0x4a6   :  { %v424_v57 = vadd.f32 %v423_v54, %v422_v50  ;;  %1441 = vmatpush3.bf16.msra.mxu0 %v552_v52  ;;  %1442 = vmatprep.mubr.msk.bf16.mxu0 %vm1600_vm0, %v1598_v1  ;;  %v721_v14 = vsel %vm37_vm1, %v716_v5, 0 }
 0x4a7   :  { %v429_v58 = vsel %vm37_vm1, %v419_v56, 0.0  ;;  %v443_v59 = vpack.c.bf16 %v419_v56, %v419_v56  ;;  %1452 = vmatprep.subr.bf16.mxu0 %v1598_v1  ;;  %v1836_v56 = vld [vmem:[%s1959_s1] ss:$0 sps:$4 sm:$0xff]  }
 0x4a8   :  { %v425_v62 = vrot.slane %v424_v57, 2  ;;  %v430_v63 = vrot.slane %v429_v58, 4 }
 0x4a9   :  { %1437 = vmatmul.mubr.msk.bf16.vlgmr.msra.gmra.mrb[12].mxu1 %vm37_vm1, %v443_v59  ;;  %v711_v12 = vpop.permute.xlu1 %710 }
 0x4aa   :  { %v426_v0 = vadd.f32 %v425_v62, %v424_v57  ;;  %v431_v2 = vadd.f32 %v430_v63, %v429_v58  ;;  %1447 = vmatpush3.bf16.msra.mxu1 %v604_v60  ;;  %1448 = vmatprep.mubr.msk.bf16.mxu1 %vm1600_vm0, %v1598_v1 }
 0x4ab   :  { %1458 = vmatprep.subr.bf16.mxu1 %v1598_v1 }
 0x4ac   :  { %v427_v3 = vrot.slane %v426_v0, 1  ;;  %v432_v4 = vrot.slane %v431_v2, 2 }
 0x4ae   :  { %v428_v6 = vadd.f32 %v427_v3, %v426_v0  ;;  %v433_v7 = vadd.f32 %v432_v4, %v431_v2 }
 0x4b0   :  { %v436_v10 = vmul.f32 0.125, %v428_v6  ;;  %v434_v11 = vrot.slane %v433_v7, 1 }
 0x4b1   :  { %1449 = vmatmul.mubr.msk.bf16.vlgmr.msra.gmra.mrb[16].mxu1 %vm37_vm1, %v1349_v13 }
 0x4b2   :  { %v438_v15 = vadd.f32 %v436_v10, %v420_v9  ;;  %v435_v16 = vadd.f32 %v434_v11, %v433_v7  ;;  %1460 = vmatprep.mubr.msk.bf16.mxu1 %vm1600_vm0, %v1598_v1  ;;  %v786_v9 = vld [vmem:[%s1963_s5 + $0x6] sm:$0x1] }
 0x4b3   :  { %1459 = vmatpush3.bf16.xpose.msra.mxu1 %v721_v14  ;;  %v1539_v14 = vld [vmem:[%s1958_s0] ss:$0 sps:$4 sm:$0xff]  }
 0x4b4   :  { %440 = vst.msk [vmem:[%s1963_s5 + $0x1] sm:$0x1] %vm177_vm4, %v438_v15  ;;  %v437_v18 = vmul.f32 0.125, %v435_v16  ;;  %1470 = vmatprep.subr.bf16.mxu1 %v1598_v1 }
 0x4b6   :  { %v439_v8 = vadd.f32 %v437_v18, %v421_v17  ;;  %v1858_v17 = vld [vmem:[%s1959_s1 + $0x4] ss:$0 sps:$4 sm:$0xff]  }
 0x4b8   :  { %441 = vst.msk [vmem:[%s1963_s5 + $0x5] sm:$0x1] %vm177_vm4, %v439_v8 }
 0x4ba   :  { %1461 = vmatmul.mubr.msk.bf16.vlgmr.msra.gmra.mrb[20].mxu1 %vm37_vm1, %v711_v12 }
 0x4bb   :  { %1472 = vmatprep.mubr.msk.bf16.mxu1 %vm1600_vm0, %v1598_v1 }
 0x578   :  { %v486_v13 = vpop.f32.mrb[12].mxu0 }
 0x579   :  { %v1432_v20 = vpop.f32.mrb[13].mxu0 }
 0x57a   :  { %v489_v21 = vpop.f32.mrb[14].mxu0 }
 0x57b   :  { %v1433_v22 = vpop.f32.mrb[15].mxu0 }
 0x57c   :  { %v534_v23 = vpop.f32.mrb[12].mxu1 }
 0x57d   :  { %v1348_v24 = vpack.c.bf16 %v534_v23, %v486_v13  ;;  %v1438_v25 = vpop.f32.mrb[13].mxu1 }
 0x57e   :  { %v537_v26 = vpop.f32.mrb[14].mxu1 }
 0x57f   :  { %v1439_v28 = vpop.f32.mrb[15].mxu1  ;;  %1443 = vmatmul.mubr.msk.bf16.vlgmr.msra.gmra.mrb[16].mxu0 %vm37_vm1, %v1348_v24 }
 0x580   :  { %1453 = vmatpush3.bf16.xpose.msra.mxu0 %v665_v27  ;;  %1454 = vmatprep.mubr.msk.bf16.mxu0 %vm1600_vm0, %v1598_v1 }
 0x581   :  { %1464 = vmatprep.subr.bf16.mxu0 %v1598_v1 }
 0x584   :  { %v640_v29 = vpop.f32.mrb[16].mxu1 }
 0x585   :  { %v1450_v31 = vpop.f32.mrb[17].mxu1 }
 0x586   :  { %v643_v32 = vpop.f32.mrb[18].mxu1 }
 0x587   :  { %v1451_v33 = vpop.f32.mrb[19].mxu1  ;;  %1455 = vmatmul.mubr.msk.bf16.vlgmr.msra.gmra.mrb[20].mxu0 %vm37_vm1, %v655_v30 }
 0x588   :  { %1466 = vmatprep.mubr.msk.bf16.mxu0 %vm1600_vm0, %v1598_v1  ;;  %v785_v33 = vld [vmem:[%s1963_s5 + $0x2] sm:$0x1] }
 0x58d   :  { %v757_v35 = vpop.f32.mrb[20].mxu1 }
 0x58e   :  { %v766_v36 = vsel %vm37_vm1, %v757_v35, -inf  ;;  %v1462_v37 = vpop.f32.mrb[21].mxu1 }
 0x58f   :  { %767 = vmax.xlane.f32.xlu1 %v766_v36  ;;  %v760_v38 = vpop.f32.mrb[22].mxu1  ;;  %v907_v37 = vld [vmem:[%s1960_s2 + $0x8] sm:$0xf] }
 0x590   :  { %v1463_v40 = vpop.f32.mrb[23].mxu1  ;;  %v917_v38 = vsel %vm187_vm2, %v907_v37, 0 }
 0x5a0   :  { %809 = vrot.lane.b32.xlu1 %v1755_v34, %s1607_s23 }
 0x5a4   :  { %974 = vrot.lane.b32.xlu1 %v1836_v56, %s1608_s26 }
 0x5a8   :  { %1030 = vrot.lane.b32.xlu1 %v1858_v17, %s1608_s26 }
 0x61c   :  { %v768_v19 = vpop.xlane.xlu1 %767 }
 0x61d   :  { %v770_v41 = vsub.f32 %v757_v35, %v768_v19 }
 0x61f   :  { %v773_v42 = vmul.f32 1.442695, %v770_v41 }
 0x620   :  { %v810_v15 = vpop.permute.xlu1 %809 }
 0x621   :  { %1558 = vpow2.f32 %v773_v42  ;;  %v815_v16 = vsel %vm187_vm2, %v810_v15, 0 }
 0x622   :  { %1465 = vmatpush3.bf16.msra.mxu0 %v815_v16 }
 0x623   :  { %1476 = vmatprep.subr.bf16.mxu0 %v1598_v1 }
 0x624   :  { %v975_v20 = vpop.permute.xlu1 %974 }
 0x625   :  { %v980_v23 = vsel %vm37_vm1, %v975_v20, 0  ;;  %v1100_v20 = vld [vmem:[%s1963_s5 + $0x3] sm:$0x1] }
 0x62b   :  { %v1559_v49 = vpop.eup %1558 }
 0x62c   :  { %v778_v55 = vsel %vm37_vm1, %v1559_v49, 0.0 }
 0x652   :  { %v588_v43 = vpop.f32.mrb[16].mxu0 }
 0x653   :  { %v1826_v44 = vadd.f32 %v640_v29, %v588_v43  ;;  %v1444_v45 = vpop.f32.mrb[17].mxu0  ;;  %v1031_v43 = vpop.permute.xlu1 %1030 }
 0x654   :  { %v591_v46 = vpop.f32.mrb[18].mxu0 }
 0x655   :  { %v1828_v47 = vadd.f32 %v643_v32, %v591_v46  ;;  %v1445_v48 = vpop.f32.mrb[19].mxu0 }
 0x656   :  { %v1036_v48 = vsel %vm37_vm1, %v1031_v43, 0 }
 0x65a   :  { %v701_v50 = vpop.f32.mrb[20].mxu0 }
 0x65b   :  { %v1456_v51 = vpop.f32.mrb[21].mxu0  ;;  %v763_v52 = vsel %vm37_vm1, %v701_v50, -inf }
 0x65c   :  { %764 = vmax.xlane.f32.xlu0 %v763_v52  ;;  %v704_v53 = vpop.f32.mrb[22].mxu0 }
 0x65d   :  { %v1457_v54 = vpop.f32.mrb[23].mxu0 }
 0x660   :  { %779 = vadd.xlane.f32.xlu0 %v778_v55 }
 0x6e9   :  { %v765_v57 = vpop.xlane.xlu0 %764 }
 0x6ea   :  { %v769_v58 = vsub.f32 %v701_v50, %v765_v57 }
 0x6ec   :  { %v771_v59 = vmul.f32 1.442695, %v769_v58 }
 0x6ed   :  { %v780_v60 = vpop.xlane.xlu0 %779 }
 0x6ee   :  { %1560 = vpow2.f32 %v771_v59 }
 0x6ef   :  { %1562 = vrcp.f32 %v780_v60 }
 0x6f8   :  { %v1561_v61 = vpop.eup %1560 }
 0x6f9   :  { %v1563_v62 = vpop.eup %1562  ;;  %v775_v63 = vsel %vm37_vm1, %v1561_v61, 0.0 }
 0x6fa   :  { %v784_v34 = vmul.f32 %v1563_v62, %v1559_v49  ;;  %776 = vadd.xlane.f32.xlu0 %v775_v63 }
 0x6fc   :  { %v794_v0 = vsel %vm37_vm1, %v784_v34, 0.0  ;;  %v808_v13 = vpack.c.bf16 %v784_v34, %v784_v34 }
 0x6fd   :  { %v795_v2 = vrot.slane %v794_v0, 4 }
 0x6ff   :  { %v796_v3 = vadd.f32 %v795_v2, %v794_v0 }
 0x701   :  { %v797_v4 = vrot.slane %v796_v3, 2 }
 0x703   :  { %v798_v5 = vadd.f32 %v797_v4, %v796_v3 }
 0x705   :  { %v799_v6 = vrot.slane %v798_v5, 1 }
 0x707   :  { %v800_v7 = vadd.f32 %v799_v6, %v798_v5 }
 0x709   :  { %v802_v10 = vmul.f32 0.125, %v800_v7 }
 0x70b   :  { %v804_v11 = vadd.f32 %v802_v10, %v786_v9 }
 0x70d   :  { %806 = vst.msk [vmem:[%s1963_s5 + $0x6] sm:$0x1] %vm177_vm4, %v804_v11 }
 0x710   :  { %857 = vrot.lane.b32.xlu0 %v1761_v39, %s1607_s23  ;;  %v1541_v39 = vld [vmem:[%s1958_s0 + $0x4] ss:$0 sps:$4 sm:$0xff]  }
 0x711   :  { %1025 = vrot.lane.b32.xlu1 %v1541_v39, %s1609_s8 }
 0x714   :  { %969 = vrot.lane.b32.xlu0 %v1539_v14, %s1609_s8 }
 0x783   :  { %v1026_v55 = vpop.permute.xlu1 %1025 }
 0x787   :  { %v777_v18 = vpop.xlane.xlu0 %776 }
 0x788   :  { %1564 = vrcp.f32 %v777_v18 }
 0x78b   :  { %v858_v8 = vpop.permute.xlu0 %857 }
 0x78c   :  { %v863_v12 = vsel %vm187_vm2, %v858_v8, 0 }
 0x78d   :  { %1471 = vmatpush3.bf16.msra.mxu1 %v863_v12 }
 0x78e   :  { %1482 = vmatprep.subr.bf16.mxu1 %v1598_v1 }
 0x78f   :  { %v970_v29 = vpop.permute.xlu0 %969 }
 0x790   :  { %1473 = vmatmul.mubr.msk.bf16.vlgmr.msra.gmra.mrb[24].mxu1 %vm37_vm1, %v808_v13 }
 0x791   :  { %1484 = vmatprep.mubr.msk.bf16.mxu1 %vm1600_vm0, %v1598_v1 }
 0x792   :  { %v1565_v21 = vpop.eup %1564 }
 0x793   :  { %v783_v22 = vmul.f32 %v1565_v21, %v1561_v61 }
 0x795   :  { %v787_v24 = vsel %vm37_vm1, %v783_v22, 0.0  ;;  %v807_v25 = vpack.c.bf16 %v783_v22, %v783_v22 }
 0x796   :  { %v788_v26 = vrot.slane %v787_v24, 4  ;;  %1483 = vmatpush3.bf16.xpose.msra.mxu1 %v980_v23 }
 0x797   :  { %1467 = vmatmul.mubr.msk.bf16.vlgmr.msra.gmra.mrb[24].mxu0 %vm37_vm1, %v807_v25  ;;  %1494 = vmatprep.subr.bf16.mxu1 %v1598_v1 }
 0x798   :  { %v789_v27 = vadd.f32 %v788_v26, %v787_v24  ;;  %1478 = vmatprep.mubr.msk.bf16.mxu0 %vm1600_vm0, %v1598_v1  ;;  %1477 = vmatpush3.bf16.msra.mxu0 %v917_v38 }
 0x799   :  { %1488 = vmatprep.subr.bf16.mxu0 %v1598_v1 }
 0x79a   :  { %v790_v28 = vrot.slane %v789_v27, 2 }
 0x79c   :  { %v791_v30 = vadd.f32 %v790_v28, %v789_v27 }
 0x79d   :  { %1485 = vmatmul.mubr.msk.bf16.vlgmr.msra.gmra.mrb[28].mxu1 %vm37_vm1, %v970_v29 }
 0x79e   :  { %v792_v31 = vrot.slane %v791_v30, 1  ;;  %1496 = vmatprep.mubr.msk.bf16.mxu1 %vm1600_vm0, %v1598_v1 }
 0x7a0   :  { %v793_v32 = vadd.f32 %v792_v31, %v791_v30  ;;  %v1222_v30 = vld [vmem:[%s1960_s2 + $0xc] sm:$0xf] }
 0x7a1   :  { %v1232_v31 = vsel %vm187_vm2, %v1222_v30, 0 }
 0x7a2   :  { %v801_v35 = vmul.f32 0.125, %v793_v32 }
 0x7a4   :  { %v803_v36 = vadd.f32 %v801_v35, %v785_v33 }
 0x7a6   :  { %805 = vst.msk [vmem:[%s1963_s5 + $0x2] sm:$0x1] %vm177_vm4, %v803_v36 }
 0x863   :  { %v899_v40 = vpop.f32.mrb[24].mxu1 }
 0x864   :  { %v1474_v19 = vpop.f32.mrb[25].mxu1 }
 0x865   :  { %v902_v41 = vpop.f32.mrb[26].mxu1 }
 0x866   :  { %v1475_v42 = vpop.f32.mrb[27].mxu1 }
 0x86a   :  { %v851_v45 = vpop.f32.mrb[24].mxu0 }
 0x86b   :  { %v1350_v46 = vpack.c.bf16 %v899_v40, %v851_v45  ;;  %v1468_v49 = vpop.f32.mrb[25].mxu0  ;;  %v1101_v45 = vld [vmem:[%s1963_s5 + $0x7] sm:$0x1] }
 0x86c   :  { %v854_v50 = vpop.f32.mrb[26].mxu0 }
 0x86d   :  { %v1469_v51 = vpop.f32.mrb[27].mxu0  ;;  %1479 = vmatmul.mubr.msk.bf16.vlgmr.msra.gmra.mrb[28].mxu0 %vm37_vm1, %v1350_v46 }
 0x86e   :  { %1489 = vmatpush3.bf16.xpose.msra.mxu0 %v1036_v48  ;;  %1490 = vmatprep.mubr.msk.bf16.mxu0 %vm1600_vm0, %v1598_v1 }
 0x86f   :  { %1500 = vmatprep.subr.bf16.mxu0 %v1598_v1 }
 0x870   :  { %v1016_v52 = vpop.f32.mrb[28].mxu1 }
 0x871   :  { %v1078_v53 = vsel %vm37_vm1, %v1016_v52, -inf  ;;  %v1486_v54 = vpop.f32.mrb[29].mxu1 }
 0x872   :  { %1079 = vmax.xlane.f32.xlu0 %v1078_v53  ;;  %v1019_v57 = vpop.f32.mrb[30].mxu1 }
 0x873   :  { %v1487_v58 = vpop.f32.mrb[31].mxu1 }
 0x875   :  { %1491 = vmatmul.mubr.msk.bf16.vlgmr.msra.gmra.mrb[32].mxu0 %vm37_vm1, %v1026_v55 }
 0x876   :  { %1502 = vmatprep.mubr.msk.bf16.mxu0 %vm1600_vm0, %v1598_v1 }
 0x8ff   :  { %v1080_v59 = vpop.xlane.xlu0 %1079 }
 0x900   :  { %v1084_v60 = vsub.f32 %v1016_v52, %v1080_v59 }
 0x902   :  { %v1086_v61 = vmul.f32 1.442695, %v1084_v60  ;;  %v1347_v60 = vld [vmem:[%s1961_s3] ss:$0 sm:$0xff] }
 0x904   :  { %1566 = vpow2.f32 %v1086_v61 }
 0x90e   :  { %v1567_v62 = vpop.eup %1566 }
 0x90f   :  { %v1090_v63 = vsel %vm37_vm1, %v1567_v62, 0.0 }
 0x910   :  { %1091 = vadd.xlane.f32.xlu0 %v1090_v63 }
 0x940   :  { %v953_v34 = vpop.f32.mrb[28].mxu0 }
 0x941   :  { %v1902_v0 = vadd.f32 %v953_v34, %v1826_v44  ;;  %v1480_v2 = vpop.f32.mrb[29].mxu0 }
 0x942   :  { %v956_v3 = vpop.f32.mrb[30].mxu0 }
 0x943   :  { %v1905_v4 = vadd.f32 %v956_v3, %v1828_v47  ;;  %v1481_v5 = vpop.f32.mrb[31].mxu0 }
 0x948   :  { %v1072_v6 = vpop.f32.mrb[32].mxu0 }
 0x949   :  { %v1492_v7 = vpop.f32.mrb[33].mxu0  ;;  %v1081_v9 = vsel %vm37_vm1, %v1072_v6, -inf }
 0x94a   :  { %1082 = vmax.xlane.f32.xlu1 %v1081_v9  ;;  %v1075_v10 = vpop.f32.mrb[34].mxu0 }
 0x94b   :  { %v1493_v11 = vpop.f32.mrb[35].mxu0 }
 0x95b   :  { %1124 = vrot.lane.b32.xlu1 %v1836_v56, %s1610_s17 }
 0x99d   :  { %v1092_v14 = vpop.xlane.xlu0 %1091 }
 0x99e   :  { %1568 = vrcp.f32 %v1092_v14 }
 0x9a8   :  { %v1569_v44 = vpop.eup %1568 }
 0x9a9   :  { %v1098_v15 = vmul.f32 %v1569_v44, %v1567_v62 }
 0x9ab   :  { %v1102_v16 = vsel %vm37_vm1, %v1098_v15, 0.0  ;;  %v1122_v27 = vpack.c.bf16 %v1098_v15, %v1098_v15 }
 0x9ac   :  { %v1103_v47 = vrot.slane %v1102_v16, 4 }
 0x9ae   :  { %v1104_v39 = vadd.f32 %v1103_v47, %v1102_v16 }
 0x9b0   :  { %v1105_v18 = vrot.slane %v1104_v39, 2 }
 0x9b2   :  { %v1106_v8 = vadd.f32 %v1105_v18, %v1104_v39 }
 0x9b4   :  { %v1107_v12 = vrot.slane %v1106_v8, 1 }
 0x9b6   :  { %v1108_v13 = vadd.f32 %v1107_v12, %v1106_v8 }
 0x9b8   :  { %v1116_v21 = vmul.f32 0.125, %v1108_v13 }
 0x9ba   :  { %v1118_v22 = vadd.f32 %v1116_v21, %v1100_v20 }
 0x9bc   :  { %1120 = vst.msk [vmem:[%s1963_s5 + $0x3] sm:$0x1] %vm177_vm4, %v1118_v22 }
 0x9d7   :  { %v1083_v56 = vpop.xlane.xlu1 %1082 }
 0x9d8   :  { %v1085_v23 = vsub.f32 %v1072_v6, %v1083_v56 }
 0x9da   :  { %v1088_v24 = vmul.f32 1.442695, %v1085_v23 }
 0x9db   :  { %v1125_v25 = vpop.permute.xlu1 %1124 }
 0x9dc   :  { %1570 = vpow2.f32 %v1088_v24  ;;  %v1130_v26 = vsel %vm187_vm2, %v1125_v25, 0 }
 0x9dd   :  { %1495 = vmatpush3.bf16.msra.mxu1 %v1130_v26 }
 0x9de   :  { %1506 = vmatprep.subr.bf16.mxu1 %v1598_v1 }
 0x9e0   :  { %1497 = vmatmul.mubr.msk.bf16.vlgmr.msra.gmra.mrb[32].mxu1 %vm37_vm1, %v1122_v27 }
 0x9e1   :  { %1508 = vmatprep.mubr.msk.bf16.mxu1 %vm1600_vm0, %v1598_v1  ;;  %1507 = vmatpush3.bf16.msra.mxu1 %v1232_v31 }
 0x9e6   :  { %v1571_v28 = vpop.eup %1570 }
 0x9e7   :  { %v1093_v29 = vsel %vm37_vm1, %v1571_v28, 0.0 }
 0x9e8   :  { %1094 = vadd.xlane.f32.xlu0 %v1093_v29 }
 0x9fe   :  { %1172 = vrot.lane.b32.xlu0 %v1858_v17, %s1610_s17 }
 0xa75   :  { %v1095_v32 = vpop.xlane.xlu0 %1094 }
 0xa76   :  { %1572 = vrcp.f32 %v1095_v32 }
 0xa79   :  { %v1173_v33 = vpop.permute.xlu0 %1172 }
 0xa7a   :  { %v1178_v35 = vsel %vm187_vm2, %v1173_v33, 0 }
 0xa7b   :  { %1501 = vmatpush3.bf16.msra.mxu0 %v1178_v35 }
 0xa80   :  { %v1573_v1 = vpop.eup %1572 }
 0xa81   :  { %v1099_v36 = vmul.f32 %v1573_v1, %v1571_v28 }
 0xa83   :  { %v1109_v37 = vsel %vm37_vm1, %v1099_v36, 0.0  ;;  %v1123_v38 = vpack.c.bf16 %v1099_v36, %v1099_v36 }
 0xa84   :  { %v1110_v40 = vrot.slane %v1109_v37, 4 }
 0xa85   :  { %1503 = vmatmul.mubr.msk.bf16.vlgmr.msra.gmra.mrb[36].mxu0 %vm37_vm1, %v1123_v38 }
 0xa86   :  { %v1111_v17 = vadd.f32 %v1110_v40, %v1109_v37 }
 0xa88   :  { %v1112_v19 = vrot.slane %v1111_v17, 2 }
 0xa8a   :  { %v1113_v41 = vadd.f32 %v1112_v19, %v1111_v17 }
 0xa8c   :  { %v1114_v42 = vrot.slane %v1113_v41, 1 }
 0xa8e   :  { %v1115_v43 = vadd.f32 %v1114_v42, %v1113_v41 }
 0xa90   :  { %v1117_v46 = vmul.f32 0.125, %v1115_v43 }
 0xa92   :  { %v1119_v48 = vadd.f32 %v1117_v46, %v1101_v45 }
 0xa94   :  { %1121 = vst.msk [vmem:[%s1963_s5 + $0x7] sm:$0x1] %vm177_vm4, %v1119_v48  ;;  %s1611_s5 = smov [#allocation2]  }
 0xa95   :  { %s1294_s29 = sshll.u32 %s1611_s5, 4  ;;  %s1295_s29 = int_to_ptr.vmem [resolvable:$true] %s1294_s29 }
 0xa96   :  { %s1574_s30 = scalar_lea.vmem %s1295_s29, 256  ;;  %p1579_p1 = scmp.lt.s32.totalorder %s1295_s29, %s1295_s29 }
 0xa97   :  { %p1575_p0 = scmp.ne.s32.totalorder %s1295_s29, %s1574_s30  ;;  %p1580_p2 = scmp.lt.s32.totalorder %s1574_s30, %s1574_s30 }
 0xa99   :  { %p1581_p3 = por %p1580_p2, %p1579_p1 }
 0xa9b   :  { %p1582_p4 = pnand %p1581_p3, %p1575_p0 }
 0xab3   :  { %v1166_v49 = vpop.f32.mrb[32].mxu1 }
 0xab4   :  { %v1498_v50 = vpop.f32.mrb[33].mxu1 }
 0xab5   :  { %v1169_v51 = vpop.f32.mrb[34].mxu1 }
 0xab6   :  { %v1499_v52 = vpop.f32.mrb[35].mxu1 }
 0xb58   :  { %v1214_v53 = vpop.f32.mrb[36].mxu0 }
 0xb59   :  { %v1351_v54 = vpack.c.bf16 %v1214_v53, %v1166_v49  ;;  %v1504_v55 = vpop.f32.mrb[37].mxu0 }
 0xb5a   :  { %v1217_v57 = vpop.f32.mrb[38].mxu0 }
 0xb5b   :  { %v1505_v58 = vpop.f32.mrb[39].mxu0  ;;  %1509 = vmatmul.mubr.msk.bf16.vlgmr.msra.gmra.mrb[36].mxu1 %vm37_vm1, %v1351_v54 }
 0xc2e   :  { %v1268_v59 = vpop.f32.mrb[36].mxu1 }
 0xc2f   :  { %v1275_v61 = vadd.f32 %v1268_v59, %v1902_v0  ;;  %v1510_v62 = vpop.f32.mrb[37].mxu1 }
 0xc30   :  { %v1271_v63 = vpop.f32.mrb[38].mxu1 }
 0xc31   :  { %v1284_v34 = vadd.f32 %v1347_v60, %v1275_v61  ;;  %v1276_v2 = vadd.f32 %v1271_v63, %v1905_v4  ;;  %v1511_v3 = vpop.f32.mrb[39].mxu1 }
 0xc33   :  { %1287 = vst.msk [vmem:[#allocation2] sm:$0xff] %vm1286_vm5, %v1284_v34  ;;  %v1285_v5 = vadd.f32 %v1347_v60, %v1276_v2 }
 0xc35   :  { %1288 = vst.msk [vmem:[#allocation2 + $0x8] sm:$0xff] %vm1286_vm5, %v1285_v5 }
 0xc36   :  { %1585 = shalt.err (!%p1582_p4)
}
 0xc37   :  { %s1586_s7 = scalar_lea.hbm %s1962_s4, 256 }
 0xc38   :  { %p1587_p5 = scmp.ne.s32.totalorder %s1962_s4, %s1586_s7  ;;  %p1590_p6 = scmp.lt.u32.totalorder %s1586_s7, %s1962_s4 }
 0xc3a   :  { %p1592_p7 = pnand %p1590_p6, %p1587_p5 }
 0xc3c   :  { %1595 = shalt.err (!%p1592_p7)
}
 0xc3d   :  { %s1612_s12 = smov 128   ;;  %s1613_s0 = smov 8  }
 0xc3e   :  { %1300 = dma.vmem_to_hbm [thread:$0]  %s1295_s29, 256, %s1962_s4, [#allocation3], %s1612_s12, %s1612_s12, %s1613_s0  }
 0xc3f   :  { %1596 = dma.done.wait [#allocation3], 256  }
 0xc40   :  { %1597 = vsyncadd [#allocation3], 4294967040 }
 0xc41   :  { %1308 = vsyncpa [#allocation3], 1 }

</bundles_post_ra>
